<compile_context>
chip_gen: v7x
topology: tpu7x:2x2x1
jax: 0.10.0
libtpu: 0.0.40
codegen_flags: <defaults>
</compile_context>

<pallas_src>
import functools
import math

import jax
import jax.numpy as jnp
from jax.experimental import pallas as pl
from jax.experimental.pallas import tpu as pltpu


CFG = dict(vocab=100, max_pos=32, H=32, NH=2, FF=64, L=2, FEAT=16, C=3, C_PAD=128)

_ENC_WEIGHTS = ["wqkv", "bqkv", "wo", "bo", "ln1_g", "ln1_b",
                "w1", "b1", "w2", "b2", "ln2_g", "ln2_b"]


# ----------------------------------------------------------------------------
# in-kernel math helpers (fp32 on the VPU/EUP)
# ----------------------------------------------------------------------------

def _bf16(x):
    return x.astype(jnp.bfloat16)


def _erf(x):
    # Abramowitz & Stegun 7.1.26 rational approximation; the divide goes to the EUP
    # (pl.reciprocal approx) so the VALU stays free under the FFN epilogue.
    ax = jnp.abs(x)
    t = pl.reciprocal(1.0 + 0.3275911 * ax, approx=True)
    poly = ((((1.061405429 * t - 1.453152027) * t + 1.421413741) * t
             - 0.284496736) * t + 0.254829592) * t
    y = 1.0 - poly * jnp.exp(-ax * ax)
    return jnp.where(x >= 0.0, y, -y)


def _gelu_exact(x):
    return 0.5 * x * (1.0 + _erf(x * 0.7071067811865476))


def _layernorm(x, g, b, eps):
    mu = jnp.mean(x, axis=-1, keepdims=True)
    var = jnp.mean(jnp.square(x - mu), axis=-1, keepdims=True)
    return (x - mu) * jax.lax.rsqrt(var + eps) * g + b


# ----------------------------------------------------------------------------
# Fused all-layer encoder kernel: grid = (B, L), activation resident in VMEM
# ----------------------------------------------------------------------------

def _encoder_kernel(emb_ref, mb_ref, embg_ref, embb_ref,
                    wqkv_ref, bqkv_ref, wo_ref, bo_ref,
                    ln1g_ref, ln1b_ref, w1_ref, b1_ref, w2_ref, b2_ref,
                    ln2g_ref, ln2b_ref,
                    o_ref, x_scratch, *, num_heads, eps):
    layer = pl.program_id(1)

    # ---- layer 0: fused embedding LayerNorm initializes the VMEM-resident activation ----
    @pl.when(layer == 0)
    def _():
        x_scratch[...] = _layernorm(emb_ref[0], embg_ref[...], embb_ref[...], eps)

    x = x_scratch[...]                                   # (S, H) fp32, never leaves VMEM
    S, H = x.shape
    NH = num_heads
    Dh = H // NH

    # ---- per-head fused QKV projection (head = MXU batch dim; scale folded into Wq) ----
    xh = jnp.broadcast_to(_bf16(x), (NH, S, H))
    qkv = jax.lax.dot_general(
        xh, wqkv_ref[0], (((2,), (1,)), ((0,), (0,))),
        preferred_element_type=jnp.float32) + bqkv_ref[0]            # (NH, S, 3*Dh)
    q = _bf16(qkv[:, :, :Dh])
    k = _bf16(qkv[:, :, Dh:2 * Dh])
    v = _bf16(qkv[:, :, 2 * Dh:])

    # ---- batched multi-head attention: no per-head loop, no concatenate ----
    s = jax.lax.dot_general(q, k, (((2,), (2,)), ((0,), (0,))),
                            preferred_element_type=jnp.float32)      # (NH, S, S)
    s = s + mb_ref[0]                                                # additive key mask
    m = jnp.max(s, axis=-1, keepdims=True)
    p = jnp.exp(s - m)
    denom = jnp.sum(p, axis=-1, keepdims=True)                       # (NH, S, 1)
    ctx = jax.lax.dot_general(_bf16(p), v, (((2,), (1,)), ((0,), (0,))),
                              preferred_element_type=jnp.float32)    # (NH, S, Dh)
    # deferred softmax normalization: scale the (NH,S,Dh) context, not (NH,S,S) probs.
    ctx = ctx * pl.reciprocal(denom, approx=True)

    # ---- output projection as per-head contraction against wo (NH,Dh,H) + head-sum ----
    attn_h = jax.lax.dot_general(_bf16(ctx), wo_ref[0], (((2,), (1,)), ((0,), (0,))),
                                 preferred_element_type=jnp.float32)  # (NH, S, H)
    attn_out = jnp.sum(attn_h, axis=0) + bo_ref[0]                    # (S, H)
    x1 = _layernorm(x + attn_out, ln1g_ref[0], ln1b_ref[0], eps)

    # ---- FFN (exact GELU) + fused residual + LayerNorm ----
    hdn = jnp.dot(_bf16(x1), w1_ref[0], preferred_element_type=jnp.float32) + b1_ref[0]
    hdn = _gelu_exact(hdn)
    ff = jnp.dot(_bf16(hdn), w2_ref[0], preferred_element_type=jnp.float32) + b2_ref[0]
    x2 = _layernorm(x1 + ff, ln2g_ref[0], ln2b_ref[0], eps)

    x_scratch[...] = x2

    # ---- only the last layer writes the (S, H) block back to HBM ----
    @pl.when(layer == pl.num_programs(1) - 1)
    def _():
        o_ref[0] = x2.astype(o_ref.dtype)


def encoder_forward(p, emb, mask_bias):
    """All L transformer layers in a single pallas_call, gridded (batch, layer)."""
    B, S, H = emb.shape
    L, NH = CFG["L"], CFG["NH"]
    enc = p["enc"]
    weights = [enc[n] for n in _ENC_WEIGHTS]

    def layer_spec(arr):
        nzeros = arr.ndim - 1
        # TODO(synk): on v6e sweep pipeline_mode=pl.Buffered(3) here if weight DMA is exposed.
        return pl.BlockSpec((1,) + arr.shape[1:],
                            lambda b, l, n=nzeros: (l,) + (0,) * n)

    kern = functools.partial(_encoder_kernel, num_heads=NH, eps=1e-12)
    return pl.pallas_call(
        kern,
        out_shape=jax.ShapeDtypeStruct((B, S, H), jnp.float32),
        grid=(B, L),
        in_specs=[pl.BlockSpec((1, S, H), lambda b, l: (b, 0, 0)),     # embeddings
                  pl.BlockSpec((1, 1, S), lambda b, l: (b, 0, 0)),     # key-mask bias
                  pl.BlockSpec((1, H), lambda b, l: (0, 0)),           # emb LN gamma
                  pl.BlockSpec((1, H), lambda b, l: (0, 0))]           # emb LN beta
                 + [layer_spec(w) for w in weights],
        out_specs=pl.BlockSpec((1, S, H), lambda b, l: (b, 0, 0)),
        scratch_shapes=[pltpu.VMEM((S, H), jnp.float32)],
        compiler_params=pltpu.CompilerParams(
            dimension_semantics=("parallel", "arbitrary"),
            vmem_limit_bytes=48 * 1024 * 1024),
    )(emb, mask_bias, p["emb_ln_g"], p["emb_ln_b"], *weights)


# ----------------------------------------------------------------------------
# Fused pooler + feature_extractor + task_classifier head
# ----------------------------------------------------------------------------

def _head_kernel(cls_ref, pw_ref, pb_ref, fw_ref, fb_ref, cw_ref, cb_ref, o_ref):
    cls = cls_ref[...]
    pooled = jnp.tanh(jnp.dot(_bf16(cls), pw_ref[...],
                              preferred_element_type=jnp.float32) + pb_ref[...])
    feat = jnp.maximum(jnp.dot(_bf16(pooled), fw_ref[...],
                               preferred_element_type=jnp.float32) + fb_ref[...], 0.0)
    logits = jnp.dot(_bf16(feat), cw_ref[...],
                     preferred_element_type=jnp.float32) + cb_ref[...]
    o_ref[...] = logits


def _full_spec(arr):
    nd = arr.ndim
    return pl.BlockSpec(arr.shape, lambda *_: (0,) * nd)


def classification_head(p, cls):
    B, _ = cls.shape
    args = (cls, p["pooler_w"], p["pooler_b"], p["feat_w"], p["feat_b"],
            p["cls_w"], p["cls_b"])
    out = pl.pallas_call(
        _head_kernel,
        out_shape=jax.ShapeDtypeStruct((B, CFG["C_PAD"]), jnp.float32),
        grid=(1,),
        in_specs=[_full_spec(a) for a in args],
        out_specs=pl.BlockSpec((B, CFG["C_PAD"]), lambda i: (0, 0)),
        compiler_params=pltpu.CompilerParams(dimension_semantics=("arbitrary",)),
    )(*args)
    return out[:, :CFG["C"]]


# ----------------------------------------------------------------------------
# Model definition (gather/glue in plain JAX, heavy compute in the fused kernels)
# ----------------------------------------------------------------------------

def init_params(key):
    H, NH, FF, L = CFG["H"], CFG["NH"], CFG["FF"], CFG["L"]
    Dh = H // NH
    FEAT, C, C_PAD = CFG["FEAT"], CFG["C"], CFG["C_PAD"]

    def dense(k, fan_in, fan_out):
        w = (0.02 * jax.random.normal(k, (fan_in, fan_out), jnp.float32)).astype(jnp.bfloat16)
        b = jnp.zeros((1, fan_out), jnp.float32)
        return w, b

    def to_heads_out(w):                      # (H, NH*Dh) -> (NH, H, Dh)
        return jnp.transpose(w.reshape(H, NH, Dh), (1, 0, 2))

    keys = jax.random.split(key, 8 + L)
    p = {}
    p["word_emb"] = 0.02 * jax.random.normal(keys[0], (CFG["vocab"], H), jnp.float32)
    p["pos_emb"] = 0.02 * jax.random.normal(keys[1], (CFG["max_pos"], H), jnp.float32)
    p["type_emb"] = 0.02 * jax.random.normal(keys[2], (2, H), jnp.float32)
    p["emb_ln_g"] = jnp.ones((1, H), jnp.float32)
    p["emb_ln_b"] = jnp.zeros((1, H), jnp.float32)

    scale = 1.0 / math.sqrt(Dh)
    layers = []
    for li in range(L):
        lk = jax.random.split(keys[3 + li], 6)
        lp = {}
        wq, _ = dense(lk[0], H, H)
        wk, _ = dense(lk[1], H, H)
        wv, _ = dense(lk[2], H, H)
        # per-head fused QKV weight (NH, H, 3*Dh); 1/sqrt(Dh) folded into the Q columns.
        lp["wqkv"] = jnp.concatenate(
            [to_heads_out(wq) * scale, to_heads_out(wk), to_heads_out(wv)],
            axis=-1).astype(jnp.bfloat16)
        lp["bqkv"] = jnp.zeros((NH, 1, 3 * Dh), jnp.float32)
        wo, lp["bo"] = dense(lk[3], H, H)
        lp["wo"] = wo.reshape(NH, Dh, H)      # head-major contraction form (no concat)
        lp["ln1_g"] = jnp.ones((1, H), jnp.float32)
        lp["ln1_b"] = jnp.zeros((1, H), jnp.float32)
        lp["w1"], lp["b1"] = dense(lk[4], H, FF)
        lp["w2"], lp["b2"] = dense(lk[5], FF, H)
        lp["ln2_g"] = jnp.ones((1, H), jnp.float32)
        lp["ln2_b"] = jnp.zeros((1, H), jnp.float32)
        layers.append(lp)
    # stack per-layer weights with a leading L axis -> single fused encoder pallas_call
    p["enc"] = {n: jnp.stack([lp[n] for lp in layers], axis=0) for n in _ENC_WEIGHTS}

    p["pooler_w"], p["pooler_b"] = dense(keys[3 + L], H, H)
    p["feat_w"], p["feat_b"] = dense(keys[4 + L], H, FEAT)
    cls_w, _ = dense(keys[5 + L], FEAT, C)
    # zero-pad classifier to a lane-dense (128-wide) output; sliced back outside.
    p["cls_w"] = jnp.zeros((FEAT, C_PAD), jnp.bfloat16).at[:, :C].set(cls_w)
    p["cls_b"] = jnp.zeros((1, C_PAD), jnp.float32)
    return p


def bert_forward(p, input_ids, attention_mask):
    B, S = input_ids.shape
    # Embedding lookup is glue (gather); the embedding LayerNorm is fused into layer 0.
    emb = (p["word_emb"][input_ids]
           + p["pos_emb"][:S][None, :, :]
           + p["type_emb"][0][None, None, :])
    # Additive key mask; fully-masked rows are assumed not to occur (as in BERT usage).
    mask_bias = (1.0 - attention_mask.astype(jnp.float32))[:, None, :] * -1e9   # (B,1,S)
    x = encoder_forward(p, emb, mask_bias)                 # one fused call for all layers
    sequence_output = x
    cls = x[:, 0, :]                                       # (B, H)
    return sequence_output, cls


def labelled_only_model_forward(p, input_data):
    """input_data: int32 [B, 2, S]; [:,0]=input_ids, [:,1]=attention_mask."""
    input_ids = input_data[:, 0]
    attention_mask = input_data[:, 1]
    _, cls = bert_forward(p, input_ids, attention_mask)
    # pooler(tanh) + feature_extractor(Linear+ReLU) + task_classifier(Linear), fused.
    class_output = classification_head(p, cls)
    return class_output


# ----------------------------------------------------------------------------

if __name__ == "__main__":
    key = jax.random.PRNGKey(0)
    pkey, dkey, _ = jax.random.split(key, 3)

    params = init_params(pkey)

    B, S = 2, 8
    input_ids = jax.random.randint(dkey, (B, S), 0, CFG["vocab"], dtype=jnp.int32)
    attention_mask = jnp.where(
        jnp.arange(S)[None, :] < jnp.array([[S], [S - 2]]), 1, 0
    ).astype(jnp.int32)
    input_data = jnp.stack([input_ids, attention_mask], axis=1)      # (B, 2, S)

    forward = jax.jit(labelled_only_model_forward)
    logits = forward(params, input_data)
    logits = jax.block_until_ready(logits)
    assert logits.shape == (B, CFG["C"])
    assert bool(jnp.all(jnp.isfinite(logits)))
    print("KERNEL_OK")
</pallas_src>

<mosaic_0001>
module attributes {stable_mosaic.version = 11 : i64} {
  func.func @_encoder_kernel(%arg0: i32, %arg1: i32, %arg2: memref<1x8x32xf32, #tpu.memory_space<vmem>>, %arg3: memref<1x1x8xf32, #tpu.memory_space<vmem>>, %arg4: memref<1x32xf32, #tpu.memory_space<vmem>>, %arg5: memref<1x32xf32, #tpu.memory_space<vmem>>, %arg6: memref<1x2x32x48xbf16, #tpu.memory_space<vmem>>, %arg7: memref<1x2x1x48xf32, #tpu.memory_space<vmem>>, %arg8: memref<1x2x16x32xbf16, #tpu.memory_space<vmem>>, %arg9: memref<1x1x32xf32, #tpu.memory_space<vmem>>, %arg10: memref<1x1x32xf32, #tpu.memory_space<vmem>>, %arg11: memref<1x1x32xf32, #tpu.memory_space<vmem>>, %arg12: memref<1x32x64xbf16, #tpu.memory_space<vmem>>, %arg13: memref<1x1x64xf32, #tpu.memory_space<vmem>>, %arg14: memref<1x64x32xbf16, #tpu.memory_space<vmem>>, %arg15: memref<1x1x32xf32, #tpu.memory_space<vmem>>, %arg16: memref<1x1x32xf32, #tpu.memory_space<vmem>>, %arg17: memref<1x1x32xf32, #tpu.memory_space<vmem>>, %arg18: memref<1x8x32xf32, #tpu.memory_space<vmem>>, %arg19: memref<8x32xf32, #tpu.memory_space<vmem>>) attributes {dimension_semantics = [#tpu.dimension_semantics<parallel>, #tpu.dimension_semantics<arbitrary>], iteration_bounds = array<i64: 2, 2>, scalar_prefetch = 0 : i64, scratch_operands = 1 : i64, tpu.core_type = #tpu.core_type<tc>, window_params = [{transform_indices = @transform_0, window_bounds = array<i64: 1, 8, 32>}, {transform_indices = @transform_1, window_bounds = array<i64: 1, 1, 8>}, {pipeline_mode = #tpu.pipeline_mode<synchronous>, transform_indices = @transform_2, window_bounds = array<i64: 1, 32>}, {pipeline_mode = #tpu.pipeline_mode<synchronous>, transform_indices = @transform_3, window_bounds = array<i64: 1, 32>}, {transform_indices = @transform_4, window_bounds = array<i64: 1, 2, 32, 48>}, {transform_indices = @transform_5, window_bounds = array<i64: 1, 2, 1, 48>}, {transform_indices = @transform_6, window_bounds = array<i64: 1, 2, 16, 32>}, {transform_indices = @transform_7, window_bounds = array<i64: 1, 1, 32>}, {transform_indices = @transform_8, window_bounds = array<i64: 1, 1, 32>}, {transform_indices = @transform_9, window_bounds = array<i64: 1, 1, 32>}, {transform_indices = @transform_10, window_bounds = array<i64: 1, 32, 64>}, {transform_indices = @transform_11, window_bounds = array<i64: 1, 1, 64>}, {transform_indices = @transform_12, window_bounds = array<i64: 1, 64, 32>}, {transform_indices = @transform_13, window_bounds = array<i64: 1, 1, 32>}, {transform_indices = @transform_14, window_bounds = array<i64: 1, 1, 32>}, {transform_indices = @transform_15, window_bounds = array<i64: 1, 1, 32>}, {transform_indices = @transform_16, window_bounds = array<i64: 1, 8, 32>}]} {
    %c0_i32 = arith.constant 0 : i32
    %0 = arith.cmpi eq, %arg1, %c0_i32 : i32
    %1 = arith.extui %0 : i1 to i32
    %c0_i32_0 = arith.constant 0 : i32
    %2 = arith.cmpi ne, %1, %c0_i32_0 : i32
    scf.if %2 {
      %c0_79 = arith.constant 0 : index
      %c0_80 = arith.constant 0 : index
      %c0_81 = arith.constant 0 : index
      %160 = vector.load %arg2[%c0_79, %c0_80, %c0_81] : memref<1x8x32xf32, #tpu.memory_space<vmem>>, vector<1x8x32xf32>
      %161 = vector.shape_cast %160 : vector<1x8x32xf32> to vector<8x32xf32>
      %c0_82 = arith.constant 0 : index
      %c0_83 = arith.constant 0 : index
      %162 = vector.load %arg4[%c0_82, %c0_83] : memref<1x32xf32, #tpu.memory_space<vmem>>, vector<1x32xf32>
      %c0_84 = arith.constant 0 : index
      %c0_85 = arith.constant 0 : index
      %163 = vector.load %arg5[%c0_84, %c0_85] : memref<1x32xf32, #tpu.memory_space<vmem>>, vector<1x32xf32>
      %cst_86 = arith.constant dense<0.000000e+00> : vector<8xf32>
      %164 = vector.multi_reduction <add>, %161, %cst_86 [1] : vector<8x32xf32> to vector<8xf32>
      %165 = vector.shape_cast %164 : vector<8xf32> to vector<8x1xf32>
      %cst_87 = arith.constant 3.200000e+01 : f32
      %166 = vector.broadcast %cst_87 : f32 to vector<8x1xf32>
      %167 = arith.divf %165, %166 : vector<8x1xf32>
      %168 = vector.broadcast %167 : vector<8x1xf32> to vector<8x32xf32>
      %169 = arith.subf %161, %168 : vector<8x32xf32>
      %170 = arith.mulf %169, %169 : vector<8x32xf32>
      %cst_88 = arith.constant dense<0.000000e+00> : vector<8xf32>
      %171 = vector.multi_reduction <add>, %170, %cst_88 [1] : vector<8x32xf32> to vector<8xf32>
      %172 = vector.shape_cast %171 : vector<8xf32> to vector<8x1xf32>
      %cst_89 = arith.constant 3.200000e+01 : f32
      %173 = vector.broadcast %cst_89 : f32 to vector<8x1xf32>
      %174 = arith.divf %172, %173 : vector<8x1xf32>
      %175 = vector.broadcast %167 : vector<8x1xf32> to vector<8x32xf32>
      %176 = arith.subf %161, %175 : vector<8x32xf32>
      %cst_90 = arith.constant 9.99999996E-13 : f32
      %177 = vector.broadcast %cst_90 : f32 to vector<8x1xf32>
      %178 = arith.addf %174, %177 : vector<8x1xf32>
      %179 = math.rsqrt %178 : vector<8x1xf32>
      %180 = vector.broadcast %179 : vector<8x1xf32> to vector<8x32xf32>
      %181 = arith.mulf %176, %180 : vector<8x32xf32>
      %182 = vector.broadcast %162 : vector<1x32xf32> to vector<8x32xf32>
      %183 = arith.mulf %181, %182 : vector<8x32xf32>
      %184 = vector.broadcast %163 : vector<1x32xf32> to vector<8x32xf32>
      %185 = arith.addf %183, %184 : vector<8x32xf32>
      %c0_91 = arith.constant 0 : index
      %c0_92 = arith.constant 0 : index
      %186 = vector.load %arg19[%c0_91, %c0_92] : memref<8x32xf32, #tpu.memory_space<vmem>>, vector<8x32xf32>
      tpu.vector_store %arg19[%c0_91, %c0_92], %185 {strides = array<i32>} : memref<8x32xf32, #tpu.memory_space<vmem>>, vector<8x32xf32>,
    } else {
    }
    %c0 = arith.constant 0 : index
    %c0_1 = arith.constant 0 : index
    %3 = vector.load %arg19[%c0, %c0_1] : memref<8x32xf32, #tpu.memory_space<vmem>>, vector<8x32xf32>
    %4 = arith.truncf %3 : vector<8x32xf32> to vector<8x32xbf16>
    %5 = vector.shape_cast %4 : vector<8x32xbf16> to vector<1x8x32xbf16>
    %6 = vector.broadcast %5 : vector<1x8x32xbf16> to vector<2x8x32xbf16>
    %c0_2 = arith.constant 0 : index
    %c0_3 = arith.constant 0 : index
    %c0_4 = arith.constant 0 : index
    %c0_5 = arith.constant 0 : index
    %7 = vector.load %arg6[%c0_2, %c0_3, %c0_4, %c0_5] : memref<1x2x32x48xbf16, #tpu.memory_space<vmem>>, vector<1x2x32x48xbf16>
    %8 = vector.shape_cast %7 : vector<1x2x32x48xbf16> to vector<2x32x48xbf16>
    %cst = arith.constant dense<0.000000e+00> : vector<2x8x48xf32>
    %9 = tpu.matmul %6, %8, %cst {dimension_numbers = #tpu.dot_dimension_numbers<[2], [1], [1], [2], [0, 0, 0, 1, 1, 2], [0], [0]>} : vector<2x8x32xbf16>, vector<2x32x48xbf16>, vector<2x8x48xf32> -> vector<2x8x48xf32>
    %c0_6 = arith.constant 0 : index
    %c0_7 = arith.constant 0 : index
    %c0_8 = arith.constant 0 : index
    %c0_9 = arith.constant 0 : index
    %10 = vector.load %arg7[%c0_6, %c0_7, %c0_8, %c0_9] : memref<1x2x1x48xf32, #tpu.memory_space<vmem>>, vector<1x2x1x48xf32>
    %11 = vector.shape_cast %10 : vector<1x2x1x48xf32> to vector<2x1x48xf32>
    %12 = vector.broadcast %11 : vector<2x1x48xf32> to vector<2x8x48xf32>
    %13 = arith.addf %9, %12 : vector<2x8x48xf32>
    %14 = vector.extract_strided_slice %13 {offsets = [0, 0, 0], sizes = [2, 8, 16], strides = [1, 1, 1]} : vector<2x8x48xf32> to vector<2x8x16xf32>
    %15 = arith.truncf %14 : vector<2x8x16xf32> to vector<2x8x16xbf16>
    %16 = vector.extract_strided_slice %13 {offsets = [0, 0, 16], sizes = [2, 8, 16], strides = [1, 1, 1]} : vector<2x8x48xf32> to vector<2x8x16xf32>
    %17 = arith.truncf %16 : vector<2x8x16xf32> to vector<2x8x16xbf16>
    %18 = vector.extract_strided_slice %13 {offsets = [0, 0, 32], sizes = [2, 8, 16], strides = [1, 1, 1]} : vector<2x8x48xf32> to vector<2x8x16xf32>
    %19 = arith.truncf %18 : vector<2x8x16xf32> to vector<2x8x16xbf16>
    %cst_10 = arith.constant dense<0.000000e+00> : vector<2x8x8xf32>
    %20 = tpu.matmul %15, %17, %cst_10 {dimension_numbers = #tpu.dot_dimension_numbers<[2], [2], [1], [1], [0, 0, 0, 1, 1, 1], [0], [0]>} : vector<2x8x16xbf16>, vector<2x8x16xbf16>, vector<2x8x8xf32> -> vector<2x8x8xf32>
    %c0_11 = arith.constant 0 : index
    %c0_12 = arith.constant 0 : index
    %c0_13 = arith.constant 0 : index
    %21 = vector.load %arg3[%c0_11, %c0_12, %c0_13] : memref<1x1x8xf32, #tpu.memory_space<vmem>>, vector<1x1x8xf32>
    %22 = vector.shape_cast %21 : vector<1x1x8xf32> to vector<1x8xf32>
    %23 = vector.shape_cast %22 : vector<1x8xf32> to vector<1x1x8xf32>
    %24 = vector.broadcast %23 : vector<1x1x8xf32> to vector<2x8x8xf32>
    %25 = arith.addf %20, %24 : vector<2x8x8xf32>
    %cst_14 = arith.constant dense<0xFF800000> : vector<2x8xf32>
    %26 = vector.multi_reduction <maximumf>, %25, %cst_14 [2] : vector<2x8x8xf32> to vector<2x8xf32>
    %27 = vector.shape_cast %26 : vector<2x8xf32> to vector<2x8x1xf32>
    %28 = vector.broadcast %27 : vector<2x8x1xf32> to vector<2x8x8xf32>
    %29 = arith.subf %25, %28 : vector<2x8x8xf32>
    %30 = math.exp %29 : vector<2x8x8xf32>
    %cst_15 = arith.constant dense<0.000000e+00> : vector<2x8xf32>
    %31 = vector.multi_reduction <add>, %30, %cst_15 [2] : vector<2x8x8xf32> to vector<2x8xf32>
    %32 = vector.shape_cast %31 : vector<2x8xf32> to vector<2x8x1xf32>
    %33 = arith.truncf %30 : vector<2x8x8xf32> to vector<2x8x8xbf16>
    %cst_16 = arith.constant dense<0.000000e+00> : vector<2x8x16xf32>
    %34 = tpu.matmul %33, %19, %cst_16 {dimension_numbers = #tpu.dot_dimension_numbers<[2], [1], [1], [2], [0, 0, 0, 1, 1, 2], [0], [0]>} : vector<2x8x8xbf16>, vector<2x8x16xbf16>, vector<2x8x16xf32> -> vector<2x8x16xf32>
    %35 = tpu.reciprocal %32 {approx = true} : vector<2x8x1xf32> -> vector<2x8x1xf32>
    %36 = vector.broadcast %35 : vector<2x8x1xf32> to vector<2x8x16xf32>
    %37 = arith.mulf %34, %36 : vector<2x8x16xf32>
    %38 = arith.truncf %37 : vector<2x8x16xf32> to vector<2x8x16xbf16>
    %c0_17 = arith.constant 0 : index
    %c0_18 = arith.constant 0 : index
    %c0_19 = arith.constant 0 : index
    %c0_20 = arith.constant 0 : index
    %39 = vector.load %arg8[%c0_17, %c0_18, %c0_19, %c0_20] : memref<1x2x16x32xbf16, #tpu.memory_space<vmem>>, vector<1x2x16x32xbf16>
    %40 = vector.shape_cast %39 : vector<1x2x16x32xbf16> to vector<2x16x32xbf16>
    %cst_21 = arith.constant dense<0.000000e+00> : vector<2x8x32xf32>
    %41 = tpu.matmul %38, %40, %cst_21 {dimension_numbers = #tpu.dot_dimension_numbers<[2], [1], [1], [2], [0, 0, 0, 1, 1, 2], [0], [0]>} : vector<2x8x16xbf16>, vector<2x16x32xbf16>, vector<2x8x32xf32> -> vector<2x8x32xf32>
    %cst_22 = arith.constant dense<0.000000e+00> : vector<8x32xf32>
    %42 = vector.multi_reduction <add>, %41, %cst_22 [0] : vector<2x8x32xf32> to vector<8x32xf32>
    %c0_23 = arith.constant 0 : index
    %c0_24 = arith.constant 0 : index
    %c0_25 = arith.constant 0 : index
    %43 = vector.load %arg9[%c0_23, %c0_24, %c0_25] : memref<1x1x32xf32, #tpu.memory_space<vmem>>, vector<1x1x32xf32>
    %44 = vector.shape_cast %43 : vector<1x1x32xf32> to vector<1x32xf32>
    %45 = vector.broadcast %44 : vector<1x32xf32> to vector<8x32xf32>
    %46 = arith.addf %42, %45 : vector<8x32xf32>
    %47 = arith.addf %3, %46 : vector<8x32xf32>
    %c0_26 = arith.constant 0 : index
    %c0_27 = arith.constant 0 : index
    %c0_28 = arith.constant 0 : index
    %48 = vector.load %arg10[%c0_26, %c0_27, %c0_28] : memref<1x1x32xf32, #tpu.memory_space<vmem>>, vector<1x1x32xf32>
    %49 = vector.shape_cast %48 : vector<1x1x32xf32> to vector<1x32xf32>
    %c0_29 = arith.constant 0 : index
    %c0_30 = arith.constant 0 : index
    %c0_31 = arith.constant 0 : index
    %50 = vector.load %arg11[%c0_29, %c0_30, %c0_31] : memref<1x1x32xf32, #tpu.memory_space<vmem>>, vector<1x1x32xf32>
    %51 = vector.shape_cast %50 : vector<1x1x32xf32> to vector<1x32xf32>
    %cst_32 = arith.constant dense<0.000000e+00> : vector<8xf32>
    %52 = vector.multi_reduction <add>, %47, %cst_32 [1] : vector<8x32xf32> to vector<8xf32>
    %53 = vector.shape_cast %52 : vector<8xf32> to vector<8x1xf32>
    %cst_33 = arith.constant 3.200000e+01 : f32
    %54 = vector.broadcast %cst_33 : f32 to vector<8x1xf32>
    %55 = arith.divf %53, %54 : vector<8x1xf32>
    %56 = vector.broadcast %55 : vector<8x1xf32> to vector<8x32xf32>
    %57 = arith.subf %47, %56 : vector<8x32xf32>
    %58 = arith.mulf %57, %57 : vector<8x32xf32>
    %cst_34 = arith.constant dense<0.000000e+00> : vector<8xf32>
    %59 = vector.multi_reduction <add>, %58, %cst_34 [1] : vector<8x32xf32> to vector<8xf32>
    %60 = vector.shape_cast %59 : vector<8xf32> to vector<8x1xf32>
    %cst_35 = arith.constant 3.200000e+01 : f32
    %61 = vector.broadcast %cst_35 : f32 to vector<8x1xf32>
    %62 = arith.divf %60, %61 : vector<8x1xf32>
    %63 = vector.broadcast %55 : vector<8x1xf32> to vector<8x32xf32>
    %64 = arith.subf %47, %63 : vector<8x32xf32>
    %cst_36 = arith.constant 9.99999996E-13 : f32
    %65 = vector.broadcast %cst_36 : f32 to vector<8x1xf32>
    %66 = arith.addf %62, %65 : vector<8x1xf32>
    %67 = math.rsqrt %66 : vector<8x1xf32>
    %68 = vector.broadcast %67 : vector<8x1xf32> to vector<8x32xf32>
    %69 = arith.mulf %64, %68 : vector<8x32xf32>
    %70 = vector.broadcast %49 : vector<1x32xf32> to vector<8x32xf32>
    %71 = arith.mulf %69, %70 : vector<8x32xf32>
    %72 = vector.broadcast %51 : vector<1x32xf32> to vector<8x32xf32>
    %73 = arith.addf %71, %72 : vector<8x32xf32>
    %74 = arith.truncf %73 : vector<8x32xf32> to vector<8x32xbf16>
    %c0_37 = arith.constant 0 : index
    %c0_38 = arith.constant 0 : index
    %c0_39 = arith.constant 0 : index
    %75 = vector.load %arg12[%c0_37, %c0_38, %c0_39] : memref<1x32x64xbf16, #tpu.memory_space<vmem>>, vector<1x32x64xbf16>
    %76 = vector.shape_cast %75 : vector<1x32x64xbf16> to vector<32x64xbf16>
    %cst_40 = arith.constant dense<0.000000e+00> : vector<8x64xf32>
    %77 = tpu.matmul %74, %76, %cst_40 {dimension_numbers = #tpu.dot_dimension_numbers<[1], [0], [0], [1], [0, 0, 1, 1], [], []>} : vector<8x32xbf16>, vector<32x64xbf16>, vector<8x64xf32> -> vector<8x64xf32>
    %c0_41 = arith.constant 0 : index
    %c0_42 = arith.constant 0 : index
    %c0_43 = arith.constant 0 : index
    %78 = vector.load %arg13[%c0_41, %c0_42, %c0_43] : memref<1x1x64xf32, #tpu.memory_space<vmem>>, vector<1x1x64xf32>
    %79 = vector.shape_cast %78 : vector<1x1x64xf32> to vector<1x64xf32>
    %80 = vector.broadcast %79 : vector<1x64xf32> to vector<8x64xf32>
    %81 = arith.addf %77, %80 : vector<8x64xf32>
    %cst_44 = arith.constant 5.000000e-01 : f32
    %82 = vector.broadcast %cst_44 : f32 to vector<8x64xf32>
    %83 = arith.mulf %82, %81 : vector<8x64xf32>
    %cst_45 = arith.constant 0.707106769 : f32
    %84 = vector.broadcast %cst_45 : f32 to vector<8x64xf32>
    %85 = arith.mulf %81, %84 : vector<8x64xf32>
    %86 = math.absf %85 : vector<8x64xf32>
    %cst_46 = arith.constant 0.327591091 : f32
    %87 = vector.broadcast %cst_46 : f32 to vector<8x64xf32>
    %88 = arith.mulf %87, %86 : vector<8x64xf32>
    %cst_47 = arith.constant 1.000000e+00 : f32
    %89 = vector.broadcast %cst_47 : f32 to vector<8x64xf32>
    %90 = arith.addf %89, %88 : vector<8x64xf32>
    %91 = tpu.reciprocal %90 {approx = true} : vector<8x64xf32> -> vector<8x64xf32>
    %cst_48 = arith.constant 1.06140542 : f32
    %92 = vector.broadcast %cst_48 : f32 to vector<8x64xf32>
    %93 = arith.mulf %92, %91 : vector<8x64xf32>
    %cst_49 = arith.constant 1.45315206 : f32
    %94 = vector.broadcast %cst_49 : f32 to vector<8x64xf32>
    %95 = arith.subf %93, %94 : vector<8x64xf32>
    %96 = arith.mulf %95, %91 : vector<8x64xf32>
    %cst_50 = arith.constant 1.42141378 : f32
    %97 = vector.broadcast %cst_50 : f32 to vector<8x64xf32>
    %98 = arith.addf %96, %97 : vector<8x64xf32>
    %99 = arith.mulf %98, %91 : vector<8x64xf32>
    %cst_51 = arith.constant 0.284496725 : f32
    %100 = vector.broadcast %cst_51 : f32 to vector<8x64xf32>
    %101 = arith.subf %99, %100 : vector<8x64xf32>
    %102 = arith.mulf %101, %91 : vector<8x64xf32>
    %cst_52 = arith.constant 0.254829586 : f32
    %103 = vector.broadcast %cst_52 : f32 to vector<8x64xf32>
    %104 = arith.addf %102, %103 : vector<8x64xf32>
    %105 = arith.mulf %104, %91 : vector<8x64xf32>
    %cst_53 = arith.constant 0.000000e+00 : f32
    %106 = vector.broadcast %cst_53 : f32 to vector<8x64xf32>
    %107 = arith.subf %106, %86 : vector<8x64xf32>
    %108 = arith.mulf %107, %86 : vector<8x64xf32>
    %109 = math.exp %108 : vector<8x64xf32>
    %110 = arith.mulf %105, %109 : vector<8x64xf32>
    %cst_54 = arith.constant 1.000000e+00 : f32
    %111 = vector.broadcast %cst_54 : f32 to vector<8x64xf32>
    %112 = arith.subf %111, %110 : vector<8x64xf32>
    %cst_55 = arith.constant 0.000000e+00 : f32
    %113 = vector.broadcast %cst_55 : f32 to vector<8x64xf32>
    %114 = arith.cmpf oge, %85, %113 : vector<8x64xf32>
    %cst_56 = arith.constant 0.000000e+00 : f32
    %115 = vector.broadcast %cst_56 : f32 to vector<8x64xf32>
    %116 = arith.subf %115, %112 : vector<8x64xf32>
    %117 = arith.select %114, %112, %116 : vector<8x64xi1>, vector<8x64xf32>
    %cst_57 = arith.constant 1.000000e+00 : f32
    %118 = vector.broadcast %cst_57 : f32 to vector<8x64xf32>
    %119 = arith.addf %118, %117 : vector<8x64xf32>
    %120 = arith.mulf %83, %119 : vector<8x64xf32>
    %121 = arith.truncf %120 : vector<8x64xf32> to vector<8x64xbf16>
    %c0_58 = arith.constant 0 : index
    %c0_59 = arith.constant 0 : index
    %c0_60 = arith.constant 0 : index
    %122 = vector.load %arg14[%c0_58, %c0_59, %c0_60] : memref<1x64x32xbf16, #tpu.memory_space<vmem>>, vector<1x64x32xbf16>
    %123 = vector.shape_cast %122 : vector<1x64x32xbf16> to vector<64x32xbf16>
    %cst_61 = arith.constant dense<0.000000e+00> : vector<8x32xf32>
    %124 = tpu.matmul %121, %123, %cst_61 {dimension_numbers = #tpu.dot_dimension_numbers<[1], [0], [0], [1], [0, 0, 1, 1], [], []>} : vector<8x64xbf16>, vector<64x32xbf16>, vector<8x32xf32> -> vector<8x32xf32>
    %c0_62 = arith.constant 0 : index
    %c0_63 = arith.constant 0 : index
    %c0_64 = arith.constant 0 : index
    %125 = vector.load %arg15[%c0_62, %c0_63, %c0_64] : memref<1x1x32xf32, #tpu.memory_space<vmem>>, vector<1x1x32xf32>
    %126 = vector.shape_cast %125 : vector<1x1x32xf32> to vector<1x32xf32>
    %127 = vector.broadcast %126 : vector<1x32xf32> to vector<8x32xf32>
    %128 = arith.addf %124, %127 : vector<8x32xf32>
    %129 = arith.addf %73, %128 : vector<8x32xf32>
    %c0_65 = arith.constant 0 : index
    %c0_66 = arith.constant 0 : index
    %c0_67 = arith.constant 0 : index
    %130 = vector.load %arg16[%c0_65, %c0_66, %c0_67] : memref<1x1x32xf32, #tpu.memory_space<vmem>>, vector<1x1x32xf32>
    %131 = vector.shape_cast %130 : vector<1x1x32xf32> to vector<1x32xf32>
    %c0_68 = arith.constant 0 : index
    %c0_69 = arith.constant 0 : index
    %c0_70 = arith.constant 0 : index
    %132 = vector.load %arg17[%c0_68, %c0_69, %c0_70] : memref<1x1x32xf32, #tpu.memory_space<vmem>>, vector<1x1x32xf32>
    %133 = vector.shape_cast %132 : vector<1x1x32xf32> to vector<1x32xf32>
    %cst_71 = arith.constant dense<0.000000e+00> : vector<8xf32>
    %134 = vector.multi_reduction <add>, %129, %cst_71 [1] : vector<8x32xf32> to vector<8xf32>
    %135 = vector.shape_cast %134 : vector<8xf32> to vector<8x1xf32>
    %cst_72 = arith.constant 3.200000e+01 : f32
    %136 = vector.broadcast %cst_72 : f32 to vector<8x1xf32>
    %137 = arith.divf %135, %136 : vector<8x1xf32>
    %138 = vector.broadcast %137 : vector<8x1xf32> to vector<8x32xf32>
    %139 = arith.subf %129, %138 : vector<8x32xf32>
    %140 = arith.mulf %139, %139 : vector<8x32xf32>
    %cst_73 = arith.constant dense<0.000000e+00> : vector<8xf32>
    %141 = vector.multi_reduction <add>, %140, %cst_73 [1] : vector<8x32xf32> to vector<8xf32>
    %142 = vector.shape_cast %141 : vector<8xf32> to vector<8x1xf32>
    %cst_74 = arith.constant 3.200000e+01 : f32
    %143 = vector.broadcast %cst_74 : f32 to vector<8x1xf32>
    %144 = arith.divf %142, %143 : vector<8x1xf32>
    %145 = vector.broadcast %137 : vector<8x1xf32> to vector<8x32xf32>
    %146 = arith.subf %129, %145 : vector<8x32xf32>
    %cst_75 = arith.constant 9.99999996E-13 : f32
    %147 = vector.broadcast %cst_75 : f32 to vector<8x1xf32>
    %148 = arith.addf %144, %147 : vector<8x1xf32>
    %149 = math.rsqrt %148 : vector<8x1xf32>
    %150 = vector.broadcast %149 : vector<8x1xf32> to vector<8x32xf32>
    %151 = arith.mulf %146, %150 : vector<8x32xf32>
    %152 = vector.broadcast %131 : vector<1x32xf32> to vector<8x32xf32>
    %153 = arith.mulf %151, %152 : vector<8x32xf32>
    %154 = vector.broadcast %133 : vector<1x32xf32> to vector<8x32xf32>
    %155 = arith.addf %153, %154 : vector<8x32xf32>
    %c0_76 = arith.constant 0 : index
    %c0_77 = arith.constant 0 : index
    %156 = vector.load %arg19[%c0_76, %c0_77] : memref<8x32xf32, #tpu.memory_space<vmem>>, vector<8x32xf32>
    tpu.vector_store %arg19[%c0_76, %c0_77], %155 {strides = array<i32>} : memref<8x32xf32, #tpu.memory_space<vmem>>, vector<8x32xf32>,
    %c1_i32 = arith.constant 1 : i32
    %157 = arith.cmpi eq, %arg1, %c1_i32 : i32
    %158 = arith.extui %157 : i1 to i32
    %c0_i32_78 = arith.constant 0 : i32
    %159 = arith.cmpi ne, %158, %c0_i32_78 : i32
    scf.if %159 {
      %c0_79 = arith.constant 0 : index
      %c0_80 = arith.constant 0 : index
      %c0_81 = arith.constant 0 : index
      %160 = vector.load %arg18[%c0_79, %c0_80, %c0_81] : memref<1x8x32xf32, #tpu.memory_space<vmem>>, vector<1x8x32xf32>
      %161 = vector.shape_cast %160 : vector<1x8x32xf32> to vector<8x32xf32>
      %162 = vector.shape_cast %155 : vector<8x32xf32> to vector<1x8x32xf32>
      tpu.vector_store %arg18[%c0_79, %c0_80, %c0_81], %162 {strides = array<i32>} : memref<1x8x32xf32, #tpu.memory_space<vmem>>, vector<1x8x32xf32>,
    } else {
    }
    return
  }
  func.func @transform_0(%arg0: i32, %arg1: i32) -> (i32, i32, i32) {
    %c0_i32 = arith.constant 0 : i32
    %c0_i32_0 = arith.constant 0 : i32
    %c0_i32_1 = arith.constant 0 : i32
    return %arg0, %c0_i32, %c0_i32_0 : i32, i32, i32
  }
  func.func @transform_1(%arg0: i32, %arg1: i32) -> (i32, i32, i32) {
    %c0_i32 = arith.constant 0 : i32
    %c0_i32_0 = arith.constant 0 : i32
    %c0_i32_1 = arith.constant 0 : i32
    return %arg0, %c0_i32, %c0_i32_0 : i32, i32, i32
  }
  func.func @transform_2(%arg0: i32, %arg1: i32) -> (i32, i32) {
    %c0_i32 = arith.constant 0 : i32
    %c0_i32_0 = arith.constant 0 : i32
    %c0_i32_1 = arith.constant 0 : i32
    return %c0_i32, %c0_i32_0 : i32, i32
  }
  func.func @transform_3(%arg0: i32, %arg1: i32) -> (i32, i32) {
    %c0_i32 = arith.constant 0 : i32
    %c0_i32_0 = arith.constant 0 : i32
    %c0_i32_1 = arith.constant 0 : i32
    return %c0_i32, %c0_i32_0 : i32, i32
  }
  func.func @transform_4(%arg0: i32, %arg1: i32) -> (i32, i32, i32, i32) {
    %c0_i32 = arith.constant 0 : i32
    %c0_i32_0 = arith.constant 0 : i32
    %c0_i32_1 = arith.constant 0 : i32
    %c0_i32_2 = arith.constant 0 : i32
    return %arg1, %c0_i32, %c0_i32_0, %c0_i32_1 : i32, i32, i32, i32
  }
  func.func @transform_5(%arg0: i32, %arg1: i32) -> (i32, i32, i32, i32) {
    %c0_i32 = arith.constant 0 : i32
    %c0_i32_0 = arith.constant 0 : i32
    %c0_i32_1 = arith.constant 0 : i32
    %c0_i32_2 = arith.constant 0 : i32
    return %arg1, %c0_i32, %c0_i32_0, %c0_i32_1 : i32, i32, i32, i32
  }
  func.func @transform_6(%arg0: i32, %arg1: i32) -> (i32, i32, i32, i32) {
    %c0_i32 = arith.constant 0 : i32
    %c0_i32_0 = arith.constant 0 : i32
    %c0_i32_1 = arith.constant 0 : i32
    %c0_i32_2 = arith.constant 0 : i32
    return %arg1, %c0_i32, %c0_i32_0, %c0_i32_1 : i32, i32, i32, i32
  }
  func.func @transform_7(%arg0: i32, %arg1: i32) -> (i32, i32, i32) {
    %c0_i32 = arith.constant 0 : i32
    %c0_i32_0 = arith.constant 0 : i32
    %c0_i32_1 = arith.constant 0 : i32
    return %arg1, %c0_i32, %c0_i32_0 : i32, i32, i32
  }
  func.func @transform_8(%arg0: i32, %arg1: i32) -> (i32, i32, i32) {
    %c0_i32 = arith.constant 0 : i32
    %c0_i32_0 = arith.constant 0 : i32
    %c0_i32_1 = arith.constant 0 : i32
    return %arg1, %c0_i32, %c0_i32_0 : i32, i32, i32
  }
  func.func @transform_9(%arg0: i32, %arg1: i32) -> (i32, i32, i32) {
    %c0_i32 = arith.constant 0 : i32
    %c0_i32_0 = arith.constant 0 : i32
    %c0_i32_1 = arith.constant 0 : i32
    return %arg1, %c0_i32, %c0_i32_0 : i32, i32, i32
  }
  func.func @transform_10(%arg0: i32, %arg1: i32) -> (i32, i32, i32) {
    %c0_i32 = arith.constant 0 : i32
    %c0_i32_0 = arith.constant 0 : i32
    %c0_i32_1 = arith.constant 0 : i32
    return %arg1, %c0_i32, %c0_i32_0 : i32, i32, i32
  }
  func.func @transform_11(%arg0: i32, %arg1: i32) -> (i32, i32, i32) {
    %c0_i32 = arith.constant 0 : i32
    %c0_i32_0 = arith.constant 0 : i32
    %c0_i32_1 = arith.constant 0 : i32
    return %arg1, %c0_i32, %c0_i32_0 : i32, i32, i32
  }
  func.func @transform_12(%arg0: i32, %arg1: i32) -> (i32, i32, i32) {
    %c0_i32 = arith.constant 0 : i32
    %c0_i32_0 = arith.constant 0 : i32
    %c0_i32_1 = arith.constant 0 : i32
    return %arg1, %c0_i32, %c0_i32_0 : i32, i32, i32
  }
  func.func @transform_13(%arg0: i32, %arg1: i32) -> (i32, i32, i32) {
    %c0_i32 = arith.constant 0 : i32
    %c0_i32_0 = arith.constant 0 : i32
    %c0_i32_1 = arith.constant 0 : i32
    return %arg1, %c0_i32, %c0_i32_0 : i32, i32, i32
  }
  func.func @transform_14(%arg0: i32, %arg1: i32) -> (i32, i32, i32) {
    %c0_i32 = arith.constant 0 : i32
    %c0_i32_0 = arith.constant 0 : i32
    %c0_i32_1 = arith.constant 0 : i32
    return %arg1, %c0_i32, %c0_i32_0 : i32, i32, i32
  }
  func.func @transform_15(%arg0: i32, %arg1: i32) -> (i32, i32, i32) {
    %c0_i32 = arith.constant 0 : i32
    %c0_i32_0 = arith.constant 0 : i32
    %c0_i32_1 = arith.constant 0 : i32
    return %arg1, %c0_i32, %c0_i32_0 : i32, i32, i32
  }
  func.func @transform_16(%arg0: i32, %arg1: i32) -> (i32, i32, i32) {
    %c0_i32 = arith.constant 0 : i32
    %c0_i32_0 = arith.constant 0 : i32
    %c0_i32_1 = arith.constant 0 : i32
    return %arg0, %c0_i32, %c0_i32_0 : i32, i32, i32
  }
}

module attributes {stable_mosaic.version = 11 : i64} {
  func.func @_head_kernel(%arg0: i32, %arg1: memref<2x32xf32, #tpu.memory_space<vmem>>, %arg2: memref<32x32xbf16, #tpu.memory_space<vmem>>, %arg3: memref<1x32xf32, #tpu.memory_space<vmem>>, %arg4: memref<32x16xbf16, #tpu.memory_space<vmem>>, %arg5: memref<1x16xf32, #tpu.memory_space<vmem>>, %arg6: memref<16x128xbf16, #tpu.memory_space<vmem>>, %arg7: memref<1x128xf32, #tpu.memory_space<vmem>>, %arg8: memref<2x128xf32, #tpu.memory_space<vmem>>) attributes {dimension_semantics = [#tpu.dimension_semantics<arbitrary>], iteration_bounds = array<i64: 1>, scalar_prefetch = 0 : i64, scratch_operands = 0 : i64, tpu.core_type = #tpu.core_type<tc>, window_params = [{pipeline_mode = #tpu.pipeline_mode<synchronous>, transform_indices = @transform_0, window_bounds = array<i64: 2, 32>}, {pipeline_mode = #tpu.pipeline_mode<synchronous>, transform_indices = @transform_1, window_bounds = array<i64: 32, 32>}, {pipeline_mode = #tpu.pipeline_mode<synchronous>, transform_indices = @transform_2, window_bounds = array<i64: 1, 32>}, {pipeline_mode = #tpu.pipeline_mode<synchronous>, transform_indices = @transform_3, window_bounds = array<i64: 32, 16>}, {pipeline_mode = #tpu.pipeline_mode<synchronous>, transform_indices = @transform_4, window_bounds = array<i64: 1, 16>}, {pipeline_mode = #tpu.pipeline_mode<synchronous>, transform_indices = @transform_5, window_bounds = array<i64: 16, 128>}, {pipeline_mode = #tpu.pipeline_mode<synchronous>, transform_indices = @transform_6, window_bounds = array<i64: 1, 128>}, {pipeline_mode = #tpu.pipeline_mode<synchronous>, transform_indices = @transform_7, window_bounds = array<i64: 2, 128>}]} {
    %c0 = arith.constant 0 : index
    %c0_0 = arith.constant 0 : index
    %0 = vector.load %arg1[%c0, %c0_0] : memref<2x32xf32, #tpu.memory_space<vmem>>, vector<2x32xf32>
    %1 = arith.truncf %0 : vector<2x32xf32> to vector<2x32xbf16>
    %c0_1 = arith.constant 0 : index
    %c0_2 = arith.constant 0 : index
    %2 = vector.load %arg2[%c0_1, %c0_2] : memref<32x32xbf16, #tpu.memory_space<vmem>>, vector<32x32xbf16>
    %cst = arith.constant dense<0.000000e+00> : vector<2x32xf32>
    %3 = tpu.matmul %1, %2, %cst {dimension_numbers = #tpu.dot_dimension_numbers<[1], [0], [0], [1], [0, 0, 1, 1], [], []>} : vector<2x32xbf16>, vector<32x32xbf16>, vector<2x32xf32> -> vector<2x32xf32>
    %c0_3 = arith.constant 0 : index
    %c0_4 = arith.constant 0 : index
    %4 = vector.load %arg3[%c0_3, %c0_4] : memref<1x32xf32, #tpu.memory_space<vmem>>, vector<1x32xf32>
    %5 = vector.broadcast %4 : vector<1x32xf32> to vector<2x32xf32>
    %6 = arith.addf %3, %5 : vector<2x32xf32>
    %7 = math.tanh %6 : vector<2x32xf32>
    %8 = arith.truncf %7 : vector<2x32xf32> to vector<2x32xbf16>
    %c0_5 = arith.constant 0 : index
    %c0_6 = arith.constant 0 : index
    %9 = vector.load %arg4[%c0_5, %c0_6] : memref<32x16xbf16, #tpu.memory_space<vmem>>, vector<32x16xbf16>
    %cst_7 = arith.constant dense<0.000000e+00> : vector<2x16xf32>
    %10 = tpu.matmul %8, %9, %cst_7 {dimension_numbers = #tpu.dot_dimension_numbers<[1], [0], [0], [1], [0, 0, 1, 1], [], []>} : vector<2x32xbf16>, vector<32x16xbf16>, vector<2x16xf32> -> vector<2x16xf32>
    %c0_8 = arith.constant 0 : index
    %c0_9 = arith.constant 0 : index
    %11 = vector.load %arg5[%c0_8, %c0_9] : memref<1x16xf32, #tpu.memory_space<vmem>>, vector<1x16xf32>
    %12 = vector.broadcast %11 : vector<1x16xf32> to vector<2x16xf32>
    %13 = arith.addf %10, %12 : vector<2x16xf32>
    %cst_10 = arith.constant 0.000000e+00 : f32
    %14 = vector.broadcast %cst_10 : f32 to vector<2x16xf32>
    %15 = arith.maximumf %13, %14 : vector<2x16xf32>
    %16 = arith.truncf %15 : vector<2x16xf32> to vector<2x16xbf16>
    %c0_11 = arith.constant 0 : index
    %c0_12 = arith.constant 0 : index
    %17 = vector.load %arg6[%c0_11, %c0_12] : memref<16x128xbf16, #tpu.memory_space<vmem>>, vector<16x128xbf16>
    %cst_13 = arith.constant dense<0.000000e+00> : vector<2x128xf32>
    %18 = tpu.matmul %16, %17, %cst_13 {dimension_numbers = #tpu.dot_dimension_numbers<[1], [0], [0], [1], [0, 0, 1, 1], [], []>} : vector<2x16xbf16>, vector<16x128xbf16>, vector<2x128xf32> -> vector<2x128xf32>
    %c0_14 = arith.constant 0 : index
    %c0_15 = arith.constant 0 : index
    %19 = vector.load %arg7[%c0_14, %c0_15] : memref<1x128xf32, #tpu.memory_space<vmem>>, vector<1x128xf32>
    %20 = vector.broadcast %19 : vector<1x128xf32> to vector<2x128xf32>
    %21 = arith.addf %18, %20 : vector<2x128xf32>
    %c0_16 = arith.constant 0 : index
    %c0_17 = arith.constant 0 : index
    %22 = vector.load %arg8[%c0_16, %c0_17] : memref<2x128xf32, #tpu.memory_space<vmem>>, vector<2x128xf32>
    tpu.vector_store %arg8[%c0_16, %c0_17], %21 {strides = array<i32>} : memref<2x128xf32, #tpu.memory_space<vmem>>, vector<2x128xf32>,
    return
  }
  func.func @transform_0(%arg0: i32) -> (i32, i32) {
    %c0_i32 = arith.constant 0 : i32
    %c0_i32_0 = arith.constant 0 : i32
    %c0_i32_1 = arith.constant 0 : i32
    return %c0_i32, %c0_i32_0 : i32, i32
  }
  func.func @transform_1(%arg0: i32) -> (i32, i32) {
    %c0_i32 = arith.constant 0 : i32
    %c0_i32_0 = arith.constant 0 : i32
    %c0_i32_1 = arith.constant 0 : i32
    return %c0_i32, %c0_i32_0 : i32, i32
  }
  func.func @transform_2(%arg0: i32) -> (i32, i32) {
    %c0_i32 = arith.constant 0 : i32
    %c0_i32_0 = arith.constant 0 : i32
    %c0_i32_1 = arith.constant 0 : i32
    return %c0_i32, %c0_i32_0 : i32, i32
  }
  func.func @transform_3(%arg0: i32) -> (i32, i32) {
    %c0_i32 = arith.constant 0 : i32
    %c0_i32_0 = arith.constant 0 : i32
    %c0_i32_1 = arith.constant 0 : i32
    return %c0_i32, %c0_i32_0 : i32, i32
  }
  func.func @transform_4(%arg0: i32) -> (i32, i32) {
    %c0_i32 = arith.constant 0 : i32
    %c0_i32_0 = arith.constant 0 : i32
    %c0_i32_1 = arith.constant 0 : i32
    return %c0_i32, %c0_i32_0 : i32, i32
  }
  func.func @transform_5(%arg0: i32) -> (i32, i32) {
    %c0_i32 = arith.constant 0 : i32
    %c0_i32_0 = arith.constant 0 : i32
    %c0_i32_1 = arith.constant 0 : i32
    return %c0_i32, %c0_i32_0 : i32, i32
  }
  func.func @transform_6(%arg0: i32) -> (i32, i32) {
    %c0_i32 = arith.constant 0 : i32
    %c0_i32_0 = arith.constant 0 : i32
    %c0_i32_1 = arith.constant 0 : i32
    return %c0_i32, %c0_i32_0 : i32, i32
  }
  func.func @transform_7(%arg0: i32) -> (i32, i32) {
    %c0_i32 = arith.constant 0 : i32
    %c0_i32_0 = arith.constant 0 : i32
    %c0_i32_1 = arith.constant 0 : i32
    return %c0_i32, %c0_i32_0 : i32, i32
  }
}

</mosaic_0001>

<bundles_post_ra>
// kernel: labelled_only_model_forward.3
= control target key start
LH: loop header
LB: loop body
LE: loop exit
PB: predicated region body
PF: predicated region fallthrough
CT: control target
= control target key end

     0   :  { %v316_v1 = vmov 0.0   ;;  %vm317_vm0 = vmmov 0   ;;  %s400_s0 = inlined_call_operand.vmem [shape: f32[2,32], index: 0, kind: input, shape index: {}]   ;;  %s401_s1 = inlined_call_operand.vmem [shape: bf16[32,32], index: 1, kind: input, shape index: {}]   ;;  %s402_s2 = inlined_call_operand.vmem [shape: f32[1,32], index: 2, kind: input, shape index: {}]   ;;  %s403_s3 = inlined_call_operand.vmem [shape: bf16[32,16], index: 3, kind: input, shape index: {}]   ;;  %s404_s4 = inlined_call_operand.vmem [shape: f32[1,16], index: 4, kind: input, shape index: {}]   ;;  %s405_s5 = inlined_call_operand.vmem [shape: bf16[16,128], index: 5, kind: input, shape index: {}]   ;;  %s406_s6 = inlined_call_operand.vmem [shape: f32[1,128], index: 6, kind: input, shape index: {}]   ;;  %s407_s7 = inlined_call_operand.hbm [shape: f32[2,128], index: 7, kind: output, shape index: {}]  }
   0x1   :  { %v285_v0 = vld [vmem:[%s401_s1] sm:$0xff]   ;;  %260 = vmatprep.subr.bf16.mxu0 %v316_v1  ;;  %268 = vmatprep.subr.bf16.mxu1 %v316_v1  ;;  %v286_v2 = vld [vmem:[%s401_s1 + $0x8] sm:$0xff]  }
   0x2   :  { %261 = vmatpush3.bf16.msra.mxu0 %v285_v0  ;;  %264 = vmatprep.mubr.msk.bf16.mxu0 %vm317_vm0, %v316_v1  ;;  %v28_v3 = vld [vmem:[%s400_s0] sm:$0x3] }
   0x3   :  { %262 = vmatprep.subr.bf16.mxu0 %v316_v1  ;;  %272 = vmatprep.mubr.msk.bf16.mxu1 %vm317_vm0, %v316_v1  ;;  %v29_v4 = vpack.c.bf16 %v28_v3, %v28_v3 }
   0x4   :  { %12 = vsyncpa [#allocation3], 0  ;;  %vm53_vm1 = vcmask 261120   ;;  %v287_v5 = vld [vmem:[%s403_s3] sm:$0xff]   ;;  %v288_v6 = vld [vmem:[%s403_s3 + $0x8] sm:$0xff]   ;;  %vm182_vm2 = vcmask 130048  }
   0x5   :  { %269 = vmatpush3.bf16.msra.mxu1 %v287_v5  ;;  %v289_v7 = vld [vmem:[%s405_s5] sm:$0xff]   ;;  %s318_s14 = smov [#allocation2]  }
   0x6   :  { %263 = vmatpush3.bf16.msra.mxu0 %v286_v2  ;;  %270 = vmatprep.subr.bf16.mxu1 %v316_v1  ;;  %v241_v8 = vld [vmem:[%s402_s2] ss:$0 sm:$0xff]  ;;  %s233_s15 = sshll.u32 %s318_s14, 4  ;;  %s234_s15 = int_to_ptr.vmem [resolvable:$true] %s233_s15 }
   0x7   :  { %276 = vmatprep.subr.bf16.mxu0 %v316_v1  ;;  %v245_v16 = vld [vmem:[%s404_s4] ss:$0 sm:$0xff]  ;;  %s292_s4 = scalar_lea.vmem %s234_s15, 32  ;;  %p297_p1 = scmp.lt.s32.totalorder %s234_s15, %s234_s15 }
   0x8   :  { %v249_v24 = vld [vmem:[%s406_s6] ss:$0 sm:$0xff]  ;;  %p293_p0 = scmp.ne.s32.totalorder %s234_s15, %s292_s4  ;;  %p298_p2 = scmp.lt.s32.totalorder %s292_s4, %s292_s4 }
   0x9   :  { %265 = vmatmul.mubr.msk.bf16.vlgmr.msra.gmra.mrb[0].mxu0 %vm53_vm1, %v29_v4  ;;  %271 = vmatpush3.bf16.msra.mxu1 %v288_v6 }
   0xa   :  { %278 = vmatprep.mubr.msk.bf16.mxu0 %vm317_vm0, %v316_v1  ;;  %277 = vmatpush3.bf16.msra.mxu0 %v289_v7  ;;  %p299_p3 = por %p298_p2, %p297_p1 }
   0xc   :  { %p300_p4 = pnand %p299_p3, %p293_p0 }
  0xdc   :  { %v91_v9 = vpop.f32.mrb[0].mxu0 }
  0xdd   :  { %v92_v10 = vadd.f32 %v241_v8, %v91_v9  ;;  %v266_v11 = vpop.f32.mrb[1].mxu0 }
  0xde   :  { %v94_v12 = vpop.f32.mrb[2].mxu0 }
  0xdf   :  { %290 = vtanh.f32 %v92_v10  ;;  %v267_v13 = vpop.f32.mrb[3].mxu0 }
  0xe9   :  { %v291_v14 = vpop.eup %290 }
  0xea   :  { %v98_v15 = vpack.c.bf16 %v291_v14, %v291_v14 }
  0xec   :  { %273 = vmatmul.mubr.msk.bf16.vlgmr.msra.gmra.mrb[0].mxu1 %vm53_vm1, %v98_v15 }
 0x1bf   :  { %v159_v17 = vpop.f32.mrb[0].mxu1 }
 0x1c0   :  { %v160_v18 = vadd.f32 %v245_v16, %v159_v17  ;;  %v274_v19 = vpop.f32.mrb[1].mxu1 }
 0x1c1   :  { %v162_v20 = vpop.f32.mrb[2].mxu1 }
 0x1c2   :  { %v165_v21 = vmax.f32 %v160_v18, 0.0  ;;  %v275_v22 = vpop.f32.mrb[3].mxu1 }
 0x1c4   :  { %v166_v23 = vpack.c.bf16 %v165_v21, %v165_v21 }
 0x1c6   :  { %279 = vmatmul.mubr.msk.bf16.vlgmr.msra.gmra.mrb[4].mxu0 %vm182_vm2, %v166_v23 }
 0x299   :  { %v220_v25 = vpop.f32.mrb[4].mxu0 }
 0x29a   :  { %v221_v26 = vadd.f32 %v249_v24, %v220_v25  ;;  %v280_v27 = vpop.f32.mrb[5].mxu0 }
 0x29b   :  { %v223_v28 = vpop.f32.mrb[6].mxu0 }
 0x29c   :  { %226 = vst [vmem:[#allocation2] sm:$0x3] %v221_v26  ;;  %v281_v29 = vpop.f32.mrb[7].mxu0 }
 0x29d   :  { %303 = shalt.err (!%p300_p4)
}
 0x29e   :  { %s304_s6 = scalar_lea.hbm %s407_s7, 32 }
 0x29f   :  { %p305_p5 = scmp.ne.s32.totalorder %s407_s7, %s304_s6  ;;  %p308_p6 = scmp.lt.u32.totalorder %s304_s6, %s407_s7 }
 0x2a1   :  { %p310_p7 = pnand %p308_p6, %p305_p5 }
 0x2a3   :  { %313 = shalt.err (!%p310_p7)
}
 0x2a4   :  { %236 = dma.vmem_to_hbm [thread:$0]  %s234_s15, 32, %s407_s7, [#allocation3]  }
 0x2a5   :  { %314 = dma.done.wait [#allocation3], 32  }
 0x2a6   :  { %315 = vsyncadd [#allocation3], 4294967264 }
 0x2a7   :  { %240 = vsyncpa [#allocation3], 1 }

// kernel: labelled_only_model_forward.2
= control target key start
LH: loop header
LB: loop body
LE: loop exit
PB: predicated region body
PF: predicated region fallthrough
CT: control target
= control target key end

     0   :  { %s2054_s21 = smov 0   ;;  %s2056_s22 = smov 0   ;;  %s2310_s0 = inlined_call_operand.vmem [shape: f32[2,8,32], index: 0, kind: input, shape index: {}]   ;;  %s2311_s1 = inlined_call_operand.vmem [shape: f32[2,1,8], index: 1, kind: input, shape index: {}]   ;;  %s2312_s2 = inlined_call_operand.vmem [shape: f32[1,32], index: 2, kind: input, shape index: {}]   ;;  %s2313_s3 = inlined_call_operand.vmem [shape: f32[1,32], index: 3, kind: input, shape index: {}]   ;;  %s2314_s4 = inlined_call_operand.vmem [shape: bf16[2,2,32,48], index: 4, kind: input, shape index: {}]   ;;  %s2315_s5 = inlined_call_operand.vmem [shape: f32[2,2,1,48], index: 5, kind: input, shape index: {}]   ;;  %s2316_s6 = inlined_call_operand.vmem [shape: bf16[2,2,16,32], index: 6, kind: input, shape index: {}]   ;;  %s2317_s7 = inlined_call_operand.vmem [shape: f32[2,1,32], index: 7, kind: input, shape index: {}]   ;;  %s2318_s8 = inlined_call_operand.vmem [shape: f32[2,1,32], index: 8, kind: input, shape index: {}]   ;;  %s2319_s9 = inlined_call_operand.vmem [shape: f32[2,1,32], index: 9, kind: input, shape index: {}]   ;;  %s2320_s10 = inlined_call_operand.vmem [shape: bf16[2,32,64], index: 10, kind: input, shape index: {}]   ;;  %s2321_s11 = inlined_call_operand.vmem [shape: f32[2,1,64], index: 11, kind: input, shape index: {}]   ;;  %s2322_s12 = inlined_call_operand.vmem [shape: bf16[2,64,32], index: 12, kind: input, shape index: {}]   ;;  %s2323_s13 = inlined_call_operand.vmem [shape: f32[2,1,32], index: 13, kind: input, shape index: {}]   ;;  %s2324_s14 = inlined_call_operand.vmem [shape: f32[2,1,32], index: 14, kind: input, shape index: {}]   ;;  %s2325_s15 = inlined_call_operand.vmem [shape: f32[2,1,32], index: 15, kind: input, shape index: {}]   ;;  %s2326_s16 = inlined_call_operand.vmem [shape: f32[2,8,32], index: 16, kind: output, shape index: {}]  }
   0x1   :  { %2334 = sst [smem:[#allocation12_spill]] %s2310_s0  ;;  %s2058_s23 = smov 0  }
   0x2   :  { %2335 = sst [smem:[#allocation13_spill]] %s2311_s1  ;;  %s2060_s24 = smov 0  }
   0x3   :  { %2336 = sst [smem:[#allocation14_spill]] %s2312_s2  ;;  %s2062_s25 = smov 0  }
   0x4   :  { %2337 = sst [smem:[#allocation15_spill]] %s2313_s3 }
   0x5   :  { %2338 = sst [smem:[#allocation16_spill]] %s2314_s4 }
   0x6   :  { %2339 = sst [smem:[#allocation17_spill]] %s2315_s5 }
   0x7   :  { %2340 = sst [smem:[#allocation18_spill]] %s2316_s6 }
   0x8   :  { %2341 = sst [smem:[#allocation19_spill]] %s2326_s16 }
   0x9 LB: > { %2342 = sst [smem:[#allocation3_spill]] %s1947_s21  ;;  %s35_s26 = sadd.s32 1, %s1955_s23  ;;  %s1963_s25 = sphi %s2062_s25, %s26_s25   ;;  %s1959_s24 = sphi %s2060_s24, %s2374_s24   ;;  %s1955_s23 = sphi %s2058_s23, %s2373_s23   ;;  %s1951_s22 = sphi %s2056_s22, %s2372_s22   ;;  %s1947_s21 = sphi %s2054_s21, %s2371_s21  }
   0xa   : > { %2343 = sst [smem:[#allocation4_spill]] %s1955_s23  ;;  %s38_s27 = sadd.s32 1, %s1959_s24 }
   0xb   : > { %2344 = sst [smem:[#allocation5_spill]] %s1959_s24  ;;  %p36_p0 = scmp.ge.s32.totalorder %s35_s26, 2 }
   0xc   : > { %2345 = sst [smem:[#allocation6_spill]] %s1963_s25  ;;  %p1697_p1 = scmp.ge.s32.totalorder %s1963_s25, 1 }
   0xd   : > { %p586_p2 = scmp.lt.s32.totalorder %s1963_s25, 5  ;;  %s2376_s26 = smov (%p36_p0, %s35_s26), 0 }
   0xe   : > { %2346 = sst [smem:[#allocation7_spill]] %s2376_s26  ;;  %s2378_s27 = smov (!%p36_p0, %s38_s27), %s1959_s24 }
   0xf   : > { %p587_p3 = pnand %p1697_p1, %p586_p2  ;;  %p40_p4 = scmp.ge.s32.totalorder %s2378_s27, 2 }
  0x11   : > { %s2380_s27 = smov (%p40_p4, %s2378_s27), 0  ;;  %590 = sbr.rel (%p587_p3) target bundleno = 2634 (0xa4a), region = 84 }
  0x12   : > { %2347 = sst [smem:[#allocation8_spill]] %s2380_s27 }
  0x18   : > { %p682_p5 = scmp.lt.s32.totalorder %s1951_s22, 1  ;;  %p689_p6 = scmp.lt.s32.totalorder %s1947_s21, 1 }
  0x19   : > { %s2350_s20 = sld [smem:[#allocation12_spill]]  ;;  %s2351_s4 = sld [smem:[#allocation16_spill]] }
  0x1a   : > { %s2382_s22 = smov (!%p682_p5, %s1951_s22), 1  ;;  %s2353_s5 = sld [smem:[#allocation17_spill]] }
  0x1b   : > { %2348 = sst [smem:[#allocation9_spill]] %s2382_s22  ;;  %s1698_s29 = sshll.u32 %s2382_s22, 3 }
  0x1c   : > { %s2090_s28 = scalar_select %p689_p6, %s1947_s21, 1 }
  0x1d   : > { %s2354_s6 = sld [smem:[#allocation18_spill]]  ;;  %s2356_s0 = sld [smem:[#allocation19_spill]] }
  0x1e   : > { %s1749_s26 = sshll.u32 %s2090_s28, 5  ;;  %s1701_s3 = sshll.u32 %s2090_s28, 1 }
  0x1f   : > { %s685_s27 = scalar_lea.vmem %s2350_s20, %s1698_s29  ;;  %s2104_s25 = scalar_lea.vmem %s2351_s4, %s1749_s26 }
  0x20   : > { %2352 = sst [smem:[#allocation10_spill]] %s2104_s25  ;;  %s2110_s16 = scalar_lea.vmem %s2353_s5, %s1701_s3 }
  0x21   : > { %s1750_s30 = sshll.u32 %s2090_s28, 4  ;;  %s2142_s19 = scalar_lea.vmem %s2322_s12, %s1749_s26 }
  0x22   : > { %s2133_s5 = scalar_lea.vmem %s2320_s10, %s1750_s30  ;;  %s727_s24 = scalar_lea.vmem %s2323_s13, %s2090_s28 }
  0x23   : > { %s2116_s1 = scalar_lea.vmem %s2354_s6, %s1750_s30  ;;  %s730_s2 = scalar_lea.vmem %s2324_s14, %s2090_s28 }
  0x24   : > { %2355 = sst [smem:[#allocation11_spill]] %s2116_s1  ;;  %s733_s21 = scalar_lea.vmem %s2325_s15, %s2090_s28 }
  0x25   : > { %s2159_s6 = scalar_lea.vmem %s2356_s0, %s1698_s29  ;;  %s2357_s1 = sld [smem:[#allocation3_spill]] }
  0x2b   : > { %p1709_p7 = scmp.ne.s32.totalorder %s2357_s1, 0 }
  0x2c   : > { %v743_v0 = vld [vmem:[%s685_s27] sm:$0xff] (!%p1709_p7)  ;;  %vm746_vm0 = vcmask (!%p1709_p7), 261120   ;;  %s2358_s20 = sld [smem:[#allocation14_spill]] (!%p1709_p7)  ;;  %s2359_s22 = sld [smem:[#allocation15_spill]] (!%p1709_p7) }
  0x2d   : > { %742 = sbr.rel (%p1709_p7) target bundleno = 359 (0x167), region = 88  ;;  %v747_v1 = vsel (!%p1709_p7), %vm746_vm0, %v743_v0, 0.0 }
  0x2e   : > { %748 = vadd.xlane.f32.xlu0 (!%p1709_p7), %v747_v1 }
  0x32   : > { %v1710_v11 = vld [vmem:[%s2358_s20] ss:$0 sm:$0xff] (!%p1709_p7) }
  0x33   : > { %v1711_v13 = vld [vmem:[%s2359_s22] ss:$0 sm:$0xff] (!%p1709_p7) }
  0xbb   : > { %v749_v2 = vpop.xlane.xlu0 %748 }
  0xbc   : > { %v751_v3 = vmul.f32 0.03125, %v749_v2 }
  0xbe   : > { %v752_v4 = vsub.f32 %v743_v0, %v751_v3 }
  0xc0   : > { %v753_v5 = vmul.f32 %v752_v4, %v752_v4 }
  0xc2   : > { %v754_v6 = vsel %vm746_vm0, %v753_v5, 0.0 }
  0xc3   : > { %755 = vadd.xlane.f32.xlu0 %v754_v6 }
 0x150   : > { %v756_v7 = vpop.xlane.xlu0 %755 }
 0x151   : > { %v757_v8 = vmul.f32 0.03125, %v756_v7 }
 0x153   : > { %v758_v9 = vadd.f32 1e-12, %v757_v8 }
 0x155   : > { %1895 = vrsqrt.f32 %v758_v9 }
 0x15f   : > { %v1896_v10 = vpop.eup %1895 }
 0x160   : > { %v760_v12 = vmul.f32 %v1896_v10, %v752_v4 }
 0x162   : > { %v767_v14 = vmul.f32 %v1710_v11, %v760_v12 }
 0x164   : > { %v774_v15 = vadd.f32 %v1711_v13, %v767_v14 }
 0x166   : > { %775 = vst.msk [vmem:[#allocation2] sm:$0xff] %vm746_vm0, %v774_v15 }
 0x167 PF: > { %s2360_s23 = sld [smem:[#allocation10_spill]]  ;;  %v1965_v17 = vmov 0.0   ;;  %vm1966_vm1 = vmmov 0   ;;  %vm812_vm2 = vcmask 261120   ;;  %v1712_v23 = vld [vmem:[%s2110_s16] ss:$0 sm:$0xff]  ;;  %s2365_s20 = scalar_lea.vmem %s2317_s7, %s2090_s28 }
 0x168   : > { %1779 = vmatprep.subr.bf16.mxu0 %v1965_v17  ;;  %1787 = vmatprep.subr.bf16.mxu1 %v1965_v17  ;;  %v1713_v24 = vld [vmem:[%s2110_s16 + $0x1] ss:$0 sm:$0xff]  ;;  %s1967_s4 = smov 112   ;;  %s1968_s25 = smov 96   ;;  %vm920_vm3 = vcmask 130048   ;;  %vm1042_vm4 = vcmask 1043456  }
 0x169   : > { %1783 = vmatprep.mubr.msk.bf16.mxu0 %vm1966_vm1, %v1965_v17  ;;  %1791 = vmatprep.mubr.msk.bf16.mxu1 %vm1966_vm1, %v1965_v17  ;;  %s2361_s16 = sld [smem:[#allocation9_spill]]  ;;  %vm1016_vm5 = vcmask 64512   ;;  %s2364_s1 = sld [smem:[#allocation11_spill]]  ;;  %vm1417_vm7 = vcmask 523264  }
 0x16a   : > { %s2362_s17 = sld [smem:[#allocation13_spill]]  ;;  %s2366_s22 = scalar_lea.vmem %s2318_s8, %s2090_s28 }
 0x16b   : > { %s2368_s3 = scalar_lea.vmem %s2321_s11, %s2090_s28  ;;  %s2369_s26 = sld [smem:[#allocation3_spill]] }
 0x16d   : > { %v1897_v16 = vld [vmem:[%s2360_s23] sm:$0xff]   ;;  %v1898_v18 = vld [vmem:[%s2360_s23 + $0x10] sm:$0xff]   ;;  %v1899_v19 = vld [vmem:[%s2360_s23 + $0x8] sm:$0xff]  }
 0x16e   : > { %1780 = vmatpush3.bf16.msra.mxu0 %v1897_v16  ;;  %1788 = vmatpush3.bf16.msra.mxu1 %v1898_v18  ;;  %v1900_v20 = vld [vmem:[%s2360_s23 + $0x18] sm:$0xff]   ;;  %v2181_v21 = vld [vmem:[#allocation2] sm:$0xff] }
 0x16f   : > { %1781 = vmatprep.subr.bf16.mxu0 %v1965_v17  ;;  %1789 = vmatprep.subr.bf16.mxu1 %v1965_v17  ;;  %v777_v22 = vpack.c.bf16 %v2181_v21, %v2181_v21  ;;  %v1901_v6 = vld [vmem:[%s2364_s1] sm:$0xff]   ;;  %v1902_v7 = vld [vmem:[%s2364_s1 + $0x8] sm:$0xff]  }
 0x170   : > { %s2363_s0 = scalar_lea.vmem %s2362_s17, %s2361_s16 }
 0x171   : > { %v1720_v43 = vld [vmem:[%s2363_s0] ss:$0 sm:$0xff]  ;;  %p1746_p8 = scmp.ne.s32.totalorder %s2369_s26, 1 }
 0x172   : > { %1782 = vmatpush3.bf16.msra.mxu0 %v1899_v19  ;;  %1790 = vmatpush3.bf16.msra.mxu1 %v1900_v20 }
 0x173   : > { %1795 = vmatprep.subr.bf16.mxu0 %v1965_v17  ;;  %1801 = vmatprep.subr.bf16.mxu1 %v1965_v17 }
 0x175   : > { %1784 = vmatmul.mubr.msk.bf16.vlgmr.msra.gmra.mrb[0].mxu0 %vm812_vm2, %v777_v22  ;;  %1792 = vmatmul.mubr.msk.bf16.vlgmr.msra.gmra.mrb[0].mxu1 %vm812_vm2, %v777_v22 }
 0x176   : > { %1797 = vmatprep.mubr.msk.bf16.mxu0 %vm1966_vm1, %v1965_v17  ;;  %1803 = vmatprep.mubr.msk.bf16.mxu1 %vm1966_vm1, %v1965_v17 }
 0x248   : > { %v850_v25 = vpop.f32.mrb[0].mxu0  ;;  %v902_v28 = vpop.f32.mrb[0].mxu1 }
 0x249   : > { %v851_v26 = vadd.f32 %v1712_v23, %v850_v25  ;;  %v1785_v27 = vpop.f32.mrb[1].mxu0  ;;  %v903_v29 = vadd.f32 %v1713_v24, %v902_v28  ;;  %v1793_v31 = vpop.f32.mrb[1].mxu1 }
 0x24a   : > { %v853_v30 = vpop.f32.mrb[2].mxu0  ;;  %v905_v34 = vpop.f32.mrb[2].mxu1 }
 0x24b   : > { %v908_v32 = vpack.c.bf16 %v851_v26, %v851_v26  ;;  %v1786_v33 = vpop.f32.mrb[3].mxu0  ;;  %v1794_v35 = vpop.f32.mrb[3].mxu1  ;;  %v909_v36 = vpack.c.bf16 %v903_v29, %v903_v29 }
 0x24c   : > { %v1729_v33 = vld [vmem:[%s2365_s20] ss:$0 sm:$0xff] }
 0x24d   : > { %918 = vrot.lane.b32.xlu0 %v908_v32, %s1967_s4 }
 0x251   : > { %968 = vrot.lane.b32.xlu0 %v909_v36, %s1967_s4 }
 0x255   : > { %1037 = vrot.lane.b32.xlu0 %v908_v32, %s1968_s25 }
 0x2bf   : > { %v919_v37 = vpop.permute.xlu0 %918 }
 0x2c0   : > { %v925_v38 = vsel %vm920_vm3, %v919_v37, 0 }
 0x2c1   : > { %1796 = vmatpush3.bf16.xpose.msra.mxu0 %v925_v38 }
 0x2c2   : > { %1807 = vmatprep.subr.bf16.mxu0 %v1965_v17 }
 0x2c3   : > { %v969_v39 = vpop.permute.xlu0 %968 }
 0x2c4   : > { %v974_v40 = vsel %vm920_vm3, %v969_v39, 0 }
 0x2c5   : > { %1802 = vmatpush3.bf16.xpose.msra.mxu1 %v974_v40 }
 0x2c6   : > { %1813 = vmatprep.subr.bf16.mxu1 %v1965_v17 }
 0x2c7   : > { %v1038_v41 = vpop.permute.xlu0 %1037 }
 0x2c8   : > { %v1044_v42 = vsel %vm1042_vm4, %v1038_v41, 0  ;;  %1798 = vmatmul.mubr.msk.bf16.vlgmr.msra.gmra.mrb[4].mxu0 %vm920_vm3, %v908_v32 }
 0x2c9   : > { %1808 = vmatpush3.bf16.msra.mxu0 %v1044_v42  ;;  %1809 = vmatprep.mubr.msk.bf16.mxu0 %vm1966_vm1, %v1965_v17 }
 0x2ca   : > { %1819 = vmatprep.subr.bf16.mxu0 %v1965_v17 }
 0x2cc   : > { %1804 = vmatmul.mubr.msk.bf16.vlgmr.msra.gmra.mrb[4].mxu1 %vm920_vm3, %v909_v36 }
 0x2cd   : > { %1815 = vmatprep.mubr.msk.bf16.mxu1 %vm1966_vm1, %v1965_v17 }
 0x39b   : > { %v961_v44 = vpop.f32.mrb[4].mxu0 }
 0x39c   : > { %v962_v45 = vadd.f32 %v1720_v43, %v961_v44  ;;  %v1799_v46 = vpop.f32.mrb[5].mxu0 }
 0x39d   : > { %v964_v47 = vpop.f32.mrb[6].mxu0  ;;  %v1903_v46 = vld [vmem:[%s2133_s5] sm:$0xff]  }
 0x39e   : > { %v1800_v48 = vpop.f32.mrb[7].mxu0  ;;  %v1017_v49 = vsel %vm1016_vm5, %v962_v45, -inf  ;;  %v1904_v47 = vld [vmem:[%s2133_s5 + $0x8] sm:$0xff]  }
 0x39f   : > { %v1010_v50 = vpop.f32.mrb[4].mxu1  ;;  %1018 = vmax.xlane.f32.xlu1 %v1017_v49 }
 0x3a0   : > { %v1011_v51 = vadd.f32 %v1720_v43, %v1010_v50  ;;  %v1805_v52 = vpop.f32.mrb[5].mxu1 }
 0x3a1   : > { %v1013_v53 = vpop.f32.mrb[6].mxu1 }
 0x3a2   : > { %v1806_v54 = vpop.f32.mrb[7].mxu1  ;;  %v1020_v55 = vsel %vm1016_vm5, %v1011_v51, -inf }
 0x3a3   : > { %1021 = vmax.xlane.f32.xlu1 %v1020_v55 }
 0x3b4   : > { %1086 = vrot.lane.b32.xlu1 %v909_v36, %s1968_s25  ;;  %s2367_s25 = scalar_lea.vmem %s2319_s9, %s2090_s28 }
 0x3b5   : > { %v1731_v53 = vld [vmem:[%s2367_s25] ss:$0 sm:$0xff] }
 0x42c   : > { %v1019_v56 = vpop.xlane.xlu1 %1018 }
 0x42d   : > { %v1023_v57 = vsub.f32 %v962_v45, %v1019_v56 }
 0x42f   : > { %v1025_v58 = vmul.f32 1.442695, %v1023_v57  ;;  %v1905_v57 = vld [vmem:[%s2142_s19] sm:$0xff]  }
 0x430   : > { %v1022_v59 = vpop.xlane.xlu1 %1021 }
 0x431   : > { %1909 = vpow2.f32 %v1025_v58  ;;  %v1024_v60 = vsub.f32 %v1011_v51, %v1022_v59  ;;  %v1730_v51 = vld [vmem:[%s2366_s22] ss:$0 sm:$0xff]  ;;  %v1906_v58 = vld [vmem:[%s2142_s19 + $0x8] sm:$0xff]   ;;  %v1907_v59 = vld [vmem:[%s2142_s19 + $0x10] sm:$0xff]  }
 0x433   : > { %v1027_v61 = vmul.f32 1.442695, %v1024_v60  ;;  %v1908_v60 = vld [vmem:[%s2142_s19 + $0x18] sm:$0xff]  }
 0x434   : > { %v1087_v62 = vpop.permute.xlu1 %1086 }
 0x435   : > { %1911 = vpow2.f32 %v1027_v61  ;;  %v1092_v63 = vsel %vm1042_vm4, %v1087_v62, 0  ;;  %v1732_v61 = vld [vmem:[%s2368_s3] ss:$0 sm:$0xff] }
 0x436   : > { %1814 = vmatpush3.bf16.msra.mxu1 %v1092_v63 }
 0x437   : > { %1825 = vmatprep.subr.bf16.mxu1 %v1965_v17 }
 0x43b   : > { %v1910_v0 = vpop.eup %1909 }
 0x43c   : > { %v1029_v1 = vsel %vm1016_vm5, %v1910_v0, 0.0  ;;  %v1035_v2 = vpack.c.bf16 %v1910_v0, %v1910_v0 }
 0x43d   : > { %1030 = vadd.xlane.f32.xlu0 %v1029_v1 }
 0x43e   : > { %1810 = vmatmul.mubr.msk.bf16.vlgmr.msra.gmra.mrb[8].mxu0 %vm1016_vm5, %v1035_v2 }
 0x43f   : > { %v1912_v3 = vpop.eup %1911  ;;  %1821 = vmatprep.mubr.msk.bf16.mxu0 %vm1966_vm1, %v1965_v17  ;;  %1820 = vmatpush3.bf16.msra.mxu0 %v1901_v6 }
 0x440   : > { %v1032_v4 = vsel %vm1016_vm5, %v1912_v3, 0.0  ;;  %v1036_v5 = vpack.c.bf16 %v1912_v3, %v1912_v3  ;;  %1831 = vmatprep.subr.bf16.mxu0 %v1965_v17 }
 0x441   : > { %1033 = vadd.xlane.f32.xlu1 %v1032_v4 }
 0x442   : > { %1816 = vmatmul.mubr.msk.bf16.vlgmr.msra.gmra.mrb[8].mxu1 %vm1016_vm5, %v1036_v5 }
 0x443   : > { %1827 = vmatprep.mubr.msk.bf16.mxu1 %vm1966_vm1, %v1965_v17  ;;  %1826 = vmatpush3.bf16.msra.mxu1 %v1902_v7 }
 0x444   : > { %1839 = vmatprep.subr.bf16.mxu1 %v1965_v17 }
 0x4ca   : > { %v1031_v8 = vpop.xlane.xlu0 %1030 }
 0x4cb   : > { %1913 = vrcp.f32 %v1031_v8 }
 0x4ce   : > { %v1034_v9 = vpop.xlane.xlu1 %1033 }
 0x4cf   : > { %1915 = vrcp.f32 %v1034_v9 }
 0x4d5   : > { %v1914_v10 = vpop.eup %1913 }
 0x4d9   : > { %v1916_v18 = vpop.eup %1915 }
 0x511   : > { %v1080_v11 = vpop.f32.mrb[8].mxu0 }
 0x512   : > { %v1136_v12 = vmul.f32 %v1914_v10, %v1080_v11  ;;  %v1811_v13 = vpop.f32.mrb[9].mxu0 }
 0x513   : > { %v1083_v14 = vpop.f32.mrb[10].mxu0 }
 0x514   : > { %v1138_v15 = vpack.c.bf16 %v1136_v12, %v1136_v12  ;;  %v1812_v16 = vpop.f32.mrb[11].mxu0 }
 0x515   : > { %v1128_v19 = vpop.f32.mrb[8].mxu1 }
 0x516   : > { %v1137_v20 = vmul.f32 %v1916_v18, %v1128_v19  ;;  %v1817_v22 = vpop.f32.mrb[9].mxu1  ;;  %1822 = vmatmul.mubr.msk.bf16.vlgmr.msra.gmra.mrb[12].mxu0 %vm920_vm3, %v1138_v15 }
 0x517   : > { %v1131_v23 = vpop.f32.mrb[10].mxu1  ;;  %1835 = vmatprep.mubr.msk.bf16.mxu0 %vm1966_vm1, %v1965_v17  ;;  %1832 = vmatpush3.bf16.msra.mxu0 %v1903_v46 }
 0x518   : > { %v1139_v24 = vpack.c.bf16 %v1137_v20, %v1137_v20  ;;  %v1818_v25 = vpop.f32.mrb[11].mxu1  ;;  %1833 = vmatprep.subr.bf16.mxu0 %v1965_v17 }
 0x51a   : > { %1828 = vmatmul.mubr.msk.bf16.vlgmr.msra.gmra.mrb[12].mxu1 %vm920_vm3, %v1139_v24 }
 0x51b   : > { %1847 = vmatprep.mubr.msk.bf16.mxu1 %vm1966_vm1, %v1965_v17  ;;  %1834 = vmatpush3.bf16.msra.mxu0 %v1904_v47  ;;  %v1744_v47 = vld [vmem:[%s730_s2] ss:$0 sm:$0xff] }
 0x51c   : > { %1840 = vmatpush3.bf16.msra.mxu1 %v1905_v57 }
 0x51d   : > { %1841 = vmatprep.subr.bf16.mxu1 %v1965_v17 }
 0x520   : > { %1842 = vmatpush3.bf16.msra.mxu1 %v1906_v58 }
 0x521   : > { %1843 = vmatprep.subr.bf16.mxu1 %v1965_v17 }
 0x524   : > { %1844 = vmatpush3.bf16.msra.mxu1 %v1907_v59 }
 0x525   : > { %1845 = vmatprep.subr.bf16.mxu1 %v1965_v17 }
 0x528   : > { %1846 = vmatpush3.bf16.msra.mxu1 %v1908_v60 }
 0x5e9   : > { %v1187_v26 = vpop.f32.mrb[12].mxu0 }
 0x5ea   : > { %v1823_v27 = vpop.f32.mrb[13].mxu0  ;;  %v1242_v31 = vsel %vm812_vm2, %v1187_v26, 0.0 }
 0x5eb   : > { %v1190_v28 = vpop.f32.mrb[14].mxu0 }
 0x5ec   : > { %v1824_v29 = vpop.f32.mrb[15].mxu0 }
 0x5ed   : > { %v1236_v30 = vpop.f32.mrb[12].mxu1 }
 0x5ee   : > { %v1243_v32 = vsel %vm812_vm2, %v1236_v30, 0.0  ;;  %v1829_v34 = vpop.f32.mrb[13].mxu1  ;;  %v1738_v30 = vld [vmem:[%s727_s24] ss:$0 sm:$0xff] }
 0x5ef   : > { %v1244_v35 = vadd.f32 %v1243_v32, %v1242_v31  ;;  %v1239_v36 = vpop.f32.mrb[14].mxu1 }
 0x5f0   : > { %v1830_v37 = vpop.f32.mrb[15].mxu1 }
 0x5f1   : > { %v1252_v38 = vadd.f32 %v1729_v33, %v1244_v35 }
 0x5f3   : > { %v1253_v39 = vadd.f32 %v1252_v38, %v2181_v21 }
 0x5f5   : > { %v1256_v40 = vsel %vm812_vm2, %v1253_v39, 0.0 }
 0x5f6   : > { %1257 = vadd.xlane.f32.xlu0 %v1256_v40 }
 0x683   : > { %v1258_v41 = vpop.xlane.xlu0 %1257 }
 0x684   : > { %v1260_v42 = vmul.f32 0.03125, %v1258_v41 }
 0x686   : > { %v1261_v43 = vsub.f32 %v1253_v39, %v1260_v42 }
 0x688   : > { %v1262_v44 = vmul.f32 %v1261_v43, %v1261_v43 }
 0x68a   : > { %v1263_v45 = vsel %vm812_vm2, %v1262_v44, 0.0 }
 0x68b   : > { %1264 = vadd.xlane.f32.xlu0 %v1263_v45 }
 0x718   : > { %v1265_v21 = vpop.xlane.xlu0 %1264 }
 0x719   : > { %v1266_v48 = vmul.f32 0.03125, %v1265_v21 }
 0x71b   : > { %v1267_v49 = vadd.f32 1e-12, %v1266_v48  ;;  %v1745_v48 = vld [vmem:[%s733_s21] ss:$0 sm:$0xff] }
 0x71d   : > { %1917 = vrsqrt.f32 %v1267_v49 }
 0x727   : > { %v1918_v50 = vpop.eup %1917 }
 0x728   : > { %v1269_v52 = vmul.f32 %v1918_v50, %v1261_v43 }
 0x72a   : > { %v1276_v54 = vmul.f32 %v1730_v51, %v1269_v52 }
 0x72c   : > { %v1283_v55 = vadd.f32 %v1731_v53, %v1276_v54 }
 0x72e   : > { %v1284_v56 = vpack.c.bf16 %v1283_v55, %v1283_v55 }
 0x730   : > { %1836 = vmatmul.mubr.msk.bf16.vlgmr.msra.gmra.mrb[16].mxu0 %vm812_vm2, %v1284_v56 }
 0x803   : > { %v1345_v62 = vpop.f32.mrb[16].mxu0 }
 0x804   : > { %v1346_v63 = vadd.f32 %v1732_v61, %v1345_v62  ;;  %v1837_v0 = vpop.f32.mrb[17].mxu0 }
 0x805   : > { %v1348_v1 = vpop.f32.mrb[18].mxu0 }
 0x806   : > { %v1352_v2 = vmul.f32 0.70710677, %v1346_v63  ;;  %v1838_v3 = vpop.f32.mrb[19].mxu0  ;;  %v1351_v26 = vmul.f32 0.5, %v1346_v63 }
 0x808   : > { %v1353_v4 = vand.u32 2147483647, %v1352_v2  ;;  %vm1372_vm6 = vcmp.ge.f32.partialorder %v1352_v2, 0.0 }
 0x80a   : > { %v1354_v5 = vmul.f32 0.3275911, %v1353_v4  ;;  %v1366_v7 = vsub.f32 0.0, %v1353_v4 }
 0x80c   : > { %v1355_v6 = vadd.f32 1.0, %v1354_v5  ;;  %v1367_v17 = vmul.f32 %v1366_v7, %v1353_v4 }
 0x80e   : > { %1919 = vrcp.f32 %v1355_v6  ;;  %v1368_v11 = vmul.f32 1.442695, %v1367_v17 }
 0x810   : > { %1921 = vpow2.f32 %v1368_v11 }
 0x818   : > { %v1920_v8 = vpop.eup %1919 }
 0x819   : > { %v1357_v9 = vmul.f32 1.0614054, %v1920_v8 }
 0x81a   : > { %v1922_v20 = vpop.eup %1921 }
 0x81b   : > { %v1736_v10 = vadd.f32 -1.4531521, %v1357_v9 }
 0x81d   : > { %v1359_v12 = vmul.f32 %v1920_v8, %v1736_v10 }
 0x81f   : > { %v1360_v13 = vadd.f32 1.4214138, %v1359_v12 }
 0x821   : > { %v1361_v14 = vmul.f32 %v1920_v8, %v1360_v13 }
 0x823   : > { %v1737_v15 = vadd.f32 -0.28449672, %v1361_v14 }
 0x825   : > { %v1363_v16 = vmul.f32 %v1920_v8, %v1737_v15 }
 0x827   : > { %v1364_v18 = vadd.f32 0.2548296, %v1363_v16 }
 0x829   : > { %v1365_v19 = vmul.f32 %v1920_v8, %v1364_v18 }
 0x82b   : > { %v1370_v22 = vmul.f32 %v1922_v20, %v1365_v19 }
 0x82d   : > { %v1371_v23 = vsub.f32 1.0, %v1370_v22 }
 0x82f   : > { %v1373_v24 = vsub.f32 0.0, %v1371_v23 }
 0x831   : > { %v1374_v25 = vsel %vm1372_vm6, %v1371_v23, %v1373_v24 }
 0x832   : > { %v1375_v27 = vadd.f32 1.0, %v1374_v25 }
 0x834   : > { %v1376_v28 = vmul.f32 %v1375_v27, %v1351_v26 }
 0x836   : > { %v1377_v29 = vpack.c.bf16 %v1376_v28, %v1376_v28 }
 0x838   : > { %1848 = vmatmul.mubr.msk.bf16.vlgmr.msra.gmra.mrb[16].mxu1 %vm1417_vm7, %v1377_v29 }
 0x90b   : > { %v1455_v31 = vpop.f32.mrb[16].mxu1 }
 0x90c   : > { %v1456_v32 = vadd.f32 %v1738_v30, %v1455_v31  ;;  %v1849_v33 = vpop.f32.mrb[17].mxu1 }
 0x90d   : > { %v1458_v34 = vpop.f32.mrb[18].mxu1 }
 0x90e   : > { %v1850_v35 = vpop.f32.mrb[19].mxu1  ;;  %v1461_v36 = vadd.f32 %v1456_v32, %v1283_v55 }
 0x910   : > { %v1464_v37 = vsel %vm812_vm2, %v1461_v36, 0.0 }
 0x911   : > { %1465 = vadd.xlane.f32.xlu0 %v1464_v37 }
 0x99e   : > { %v1466_v38 = vpop.xlane.xlu0 %1465 }
 0x99f   : > { %v1467_v39 = vmul.f32 0.03125, %v1466_v38 }
 0x9a1   : > { %v1468_v40 = vsub.f32 %v1461_v36, %v1467_v39 }
 0x9a3   : > { %v1469_v41 = vmul.f32 %v1468_v40, %v1468_v40 }
 0x9a5   : > { %v1470_v42 = vsel %vm812_vm2, %v1469_v41, 0.0 }
 0x9a6   : > { %1471 = vadd.xlane.f32.xlu0 %v1470_v42 }
 0xa33   : > { %v1472_v43 = vpop.xlane.xlu0 %1471 }
 0xa34   : > { %v1473_v44 = vmul.f32 0.03125, %v1472_v43 }
 0xa36   : > { %v1474_v45 = vadd.f32 1e-12, %v1473_v44 }
 0xa38   : > { %1923 = vrsqrt.f32 %v1474_v45 }
 0xa42   : > { %v1924_v46 = vpop.eup %1923 }
 0xa43   : > { %v1476_v21 = vmul.f32 %v1924_v46, %v1468_v40  ;;  %1495 = sbr.rel (%p1746_p8) target bundleno = 2634 (0xa4a), region = 92 }
 0xa45   : > { %v1483_v49 = vmul.f32 %v1744_v47, %v1476_v21 }
 0xa47   : > { %v1490_v50 = vadd.f32 %v1745_v48, %v1483_v49 }
 0xa49   : > { %1491 = vst.msk [vmem:[#allocation2] sm:$0xff] %vm812_vm2, %v1490_v50  ;;  %1496 = vst.msk [vmem:[%s2159_s6] sm:$0xff] (!%p1746_p8), %vm812_vm2, %v1490_v50 }
 0xa4a PF: > { %s2370_s29 = sld [smem:[#allocation6_spill]]  ;;  %s2371_s21 = sld [smem:[#allocation4_spill]] }
 0xa4b   : > { %s2372_s22 = sld [smem:[#allocation5_spill]]  ;;  %s2373_s23 = sld [smem:[#allocation7_spill]] }
 0xa4c   : > { %s2374_s24 = sld [smem:[#allocation8_spill]] }
 0xa50   : > { %s26_s25 = sadd.s32 1, %s2370_s29  }
 0xa51   : > { %p23_p9 = scmp.ge.s32.totalorder %s26_s25, 6  }
 0xa53   :  { %25 = sbr.rel (!%p23_p9) target bundleno = 9 (0x9), region = 161 }

</bundles_post_ra>
